<compile_context>
chip_gen: v7x
topology: tpu7x:2x2x1
jax: 0.10.0
libtpu: 0.0.40
codegen_flags: <defaults>
</compile_context>

<pallas_src>
import math

import jax
import jax.numpy as jnp
from jax import lax
from jax.experimental import pallas as pl
from jax.experimental.pallas import tpu as pltpu


def _make_kernel(Tc, H, pt, has_pad, mx_dtype):
    """Builds the per-(batch-tile, time-chunk) kernel body."""

    def kernel(xp_ref, cf_ref, winx_ref, winc_ref, bin_ref,
               wlstm_ref, blstm_ref, wout_ref, bout_ref,
               out_ref, hn_ref, cn_ref,
               h_sc, c_sc, xh_sc, tbuf_sc):
        tb = h_sc.shape[0]
        nx = xp_ref.shape[-1]
        nc = cf_ref.shape[-1]
        ny = out_ref.shape[-1]
        tc = pl.program_id(1)

        # hx / cx default to zeros (CudnnLstm.forward with hx=None, cx=None).
        @pl.when(tc == 0)
        def _():
            h_sc[...] = jnp.zeros_like(h_sc)
            c_sc[...] = jnp.zeros_like(c_sc)
            xh_sc[:, H:] = jnp.zeros((tb, H), mx_dtype)   # h half of gate LHS

        # ---- chunk-batched linearIn + ReLU (no recurrence -> one big matmul) ----
        xp = xp_ref[...].reshape(Tc * tb, nx).astype(mx_dtype)
        cf = cf_ref[...].reshape(Tc * tb, nc).astype(mx_dtype)
        xin = (jnp.dot(xp, winx_ref[...], preferred_element_type=jnp.float32)
               + jnp.dot(cf, winc_ref[...], preferred_element_type=jnp.float32)
               + bin_ref[...])
        xin = jnp.maximum(xin, 0.0)
        tbuf_sc[...] = xin.reshape(Tc, tb, H).astype(mx_dtype)

        # ---- sequential LSTM cell over the chunk (h/c carried in f32) ----
        def step(t, carry):
            h, c = carry
            xh_sc[:, :H] = tbuf_sc[t]            # xt into fused-gate LHS
            gates = (jnp.dot(xh_sc[...], wlstm_ref[...],
                             preferred_element_type=jnp.float32)
                     + blstm_ref[...])
            # cuDNN gate order: i, f, g, o  (lane-aligned when H % 128 == 0)
            g_i = jax.nn.sigmoid(gates[:, 0 * H:1 * H])
            g_f = jax.nn.sigmoid(gates[:, 1 * H:2 * H])
            g_g = jnp.tanh(gates[:, 2 * H:3 * H])
            g_o = jax.nn.sigmoid(gates[:, 3 * H:4 * H])
            c_new = g_f * c + g_i * g_g
            h_new = g_o * jnp.tanh(c_new)
            if has_pad:                           # freeze state on padded steps
                valid = (tc * Tc + t) < pt
                c_new = jnp.where(valid, c_new, c)
                h_new = jnp.where(valid, h_new, h)
            h_mx = h_new.astype(mx_dtype)
            xh_sc[:, H:] = h_mx                   # h feeds next step's gate matmul
            tbuf_sc[t] = h_mx                     # reuse buffer for chunk linearOut
            return h_new, c_new

        h_fin, c_fin = lax.fori_loop(0, Tc, step, (h_sc[...], c_sc[...]))
        h_sc[...] = h_fin                         # f32 carry into next chunk
        c_sc[...] = c_fin
        hn_ref[...] = h_fin.astype(hn_ref.dtype)  # VMEM-resident, written back once
        cn_ref[...] = c_fin.astype(cn_ref.dtype)

        # ---- chunk-batched linearOut (one matmul + one store per chunk) ----
        hall = tbuf_sc[...].reshape(Tc * tb, H)
        out = (jnp.dot(hall, wout_ref[...], preferred_element_type=jnp.float32)
               + bout_ref[...])
        out_ref[...] = out.reshape(Tc, tb, ny).astype(out_ref.dtype)

    return kernel


def lstm_cnn_forecast_forward(x, cnn_feat, params, *, ct,
                              batch_tile=None, time_chunk=16, use_bf16=True):
    """Pallas forward of LstmCnnForcast minus the (unspecified) Cnn1d.

    x        : [nt, ngrid, nx]
    cnn_feat : [pt, ngrid, cnnSize]   (pt = nt - ct), stand-in for Cnn1d output
    returns  : out [pt, ngrid, ny], hn [ngrid, H], cn [ngrid, H]
    """
    nt, B, nx = x.shape
    pt, _, cnn_size = cnn_feat.shape
    assert pt == nt - ct
    H = params['w_hh'].shape[1]
    ny = params['linearOut_w'].shape[0]
    mx_dtype = jnp.bfloat16 if use_bf16 else jnp.float32

    # --- one-time weight prep (bf16 matmul operands, f32 biases) ---
    w_in = params['linearIn_w'].T                                  # [nx+cnn, H]
    w_in_x = w_in[:nx].astype(mx_dtype)                            # [nx, H]
    w_in_c = w_in[nx:].astype(mx_dtype)                            # [cnn, H]
    b_in = params['linearIn_b'].reshape(1, H).astype(jnp.float32)
    w_lstm = jnp.concatenate([params['w_ih'].T, params['w_hh'].T],
                             axis=0).astype(mx_dtype)              # [2H, 4H]
    b_lstm = (params['b_ih'] + params['b_hh']).reshape(1, 4 * H).astype(jnp.float32)
    w_out = params['linearOut_w'].T.astype(mx_dtype)               # [H, ny]
    b_out = params['linearOut_b'].reshape(1, ny).astype(jnp.float32)

    # --- tiling: fill MXU M with the batch tile, chunk the time axis ---
    if batch_tile is None:
        batch_tile = next(d for d in range(min(B, 256), 0, -1)
                          if B % d == 0 and (d % 8 == 0 or d == B))
    tb = batch_tile
    assert B % tb == 0 and (tb % 8 == 0 or tb == B)
    nb = B // tb

    Tc = max(1, min(time_chunk, pt))
    n_chunks = (pt + Tc - 1) // Tc
    pt_pad = n_chunks * Tc
    has_pad = pt_pad != pt

    x_post = x[ct:]                                                # [pt, B, nx]
    if has_pad:
        pad = ((0, pt_pad - pt), (0, 0), (0, 0))
        x_post = jnp.pad(x_post, pad)
        cnn_feat = jnp.pad(cnn_feat, pad)

    # --- VMEM budget estimate (double-buffered streams + resident weights) ---
    bs = 2 if use_bf16 else 4
    itm = x.dtype.itemsize
    need = (2 * Tc * tb * (nx + cnn_size) * itm          # x / cnn_feat in-stream
            + 2 * Tc * tb * ny * itm                     # out-stream
            + 2 * 2 * tb * H * itm                       # hn / cn blocks
            + 2 * ((nx + cnn_size) * H + 8 * H * H + H * ny) * bs   # weights
            + 2 * (H + 4 * H + ny) * 4                   # biases
            + 2 * tb * H * 4 + tb * 2 * H * bs + Tc * tb * H * bs)  # scratch
    vmem_budget = int(min(max(32 << 20, 2 * need), 64 << 20))  # v7x-safe cap

    const2d = lambda b, t: (0, 0)      # resident weights/biases: DMA'd once
    grid_spec = pltpu.PrefetchScalarGridSpec(
        num_scalar_prefetch=0,
        grid=(nb, n_chunks),           # (batch tiles: parallel, time chunks: arbitrary)
        in_specs=[
            pl.BlockSpec((Tc, tb, nx), lambda b, t: (t, b, 0)),        # x[ct:] chunk
            pl.BlockSpec((Tc, tb, cnn_size), lambda b, t: (t, b, 0)),  # cnn chunk
            pl.BlockSpec((nx, H), const2d),                            # W_in (x half)
            pl.BlockSpec((cnn_size, H), const2d),                      # W_in (cnn half)
            pl.BlockSpec((1, H), const2d),                             # b_in
            pl.BlockSpec((2 * H, 4 * H), const2d),                     # W_lstm
            pl.BlockSpec((1, 4 * H), const2d),                         # b_lstm
            pl.BlockSpec((H, ny), const2d),                            # W_out
            pl.BlockSpec((1, ny), const2d),                            # b_out
        ],
        out_specs=(
            pl.BlockSpec((Tc, tb, ny), lambda b, t: (t, b, 0)),        # out chunk
            pl.BlockSpec((tb, H), lambda b, t: (b, 0)),                # hn (resident)
            pl.BlockSpec((tb, H), lambda b, t: (b, 0)),                # cn (resident)
        ),
        scratch_shapes=[
            pltpu.VMEM((tb, H), jnp.float32),        # h carry (f32 across chunks)
            pltpu.VMEM((tb, H), jnp.float32),        # c carry (f32 across chunks)
            pltpu.VMEM((tb, 2 * H), mx_dtype),       # fused-gate LHS [xt | h]
            pltpu.VMEM((Tc, tb, H), mx_dtype),       # chunk buffer: xin, then h
        ],
    )

    out, hn, cn = pl.pallas_call(
        _make_kernel(Tc, H, pt, has_pad, mx_dtype),
        out_shape=(jax.ShapeDtypeStruct((pt_pad, B, ny), x.dtype),
                   jax.ShapeDtypeStruct((B, H), x.dtype),
                   jax.ShapeDtypeStruct((B, H), x.dtype)),
        grid_spec=grid_spec,
        compiler_params=pltpu.CompilerParams(
            dimension_semantics=("parallel", "arbitrary"),
            vmem_limit_bytes=vmem_budget,
        ),
    )(x_post, cnn_feat, w_in_x, w_in_c, b_in, w_lstm, b_lstm, w_out, b_out)

    out = out[:pt] if has_pad else out
    return out, hn, cn


def _init_params(key, *, nx, cnn_size, hidden, ny, dtype=jnp.float32):
    """U(-std, std) init, std = 1/sqrt(H), matching reset_parameters."""
    std = 1.0 / math.sqrt(hidden)
    shapes = {
        'linearIn_w': (hidden, nx + cnn_size),
        'linearIn_b': (hidden,),
        'w_ih': (4 * hidden, hidden),
        'w_hh': (4 * hidden, hidden),
        'b_ih': (4 * hidden,),
        'b_hh': (4 * hidden,),
        'linearOut_w': (ny, hidden),
        'linearOut_b': (ny,),
    }
    keys = jax.random.split(key, len(shapes))
    return {name: jax.random.uniform(k, shape, dtype=dtype,
                                     minval=-std, maxval=std)
            for k, (name, shape) in zip(keys, shapes.items())}


def _reference(x, cnn_feat, params, *, ct):
    """Pure-JAX reference mirroring the PyTorch forward (no dropout)."""
    H = params['w_hh'].shape[1]
    B = x.shape[1]
    x2 = jnp.concatenate([x[ct:], cnn_feat], axis=2)
    xin = jax.nn.relu(
        jnp.einsum('tbf,hf->tbh', x2, params['linearIn_w']) + params['linearIn_b'])

    def step(carry, xt):
        h, c = carry
        gates = (xt @ params['w_ih'].T + params['b_ih']
                 + h @ params['w_hh'].T + params['b_hh'])
        i = jax.nn.sigmoid(gates[:, 0 * H:1 * H])
        f = jax.nn.sigmoid(gates[:, 1 * H:2 * H])
        g = jnp.tanh(gates[:, 2 * H:3 * H])
        o = jax.nn.sigmoid(gates[:, 3 * H:4 * H])
        c = f * c + i * g
        h = o * jnp.tanh(c)
        return (h, c), h

    h0 = jnp.zeros((B, H), x.dtype)
    c0 = jnp.zeros((B, H), x.dtype)
    (hn, cn), hs = jax.lax.scan(step, (h0, c0), xin)
    out = jnp.einsum('tbh,yh->tby', hs, params['linearOut_w']) + params['linearOut_b']
    return out, hn, cn


if __name__ == "__main__":
    # pt=20 with Tc=16 exercises the padded/masked last chunk; B=16 with
    # batch_tile=8 exercises nb=2 (multi batch tile / both v7x TensorCores).
    nt, ngrid, nx = 36, 16, 8
    ct = 16
    pt = nt - ct
    hidden = 128            # multiple of 128 -> lane-dense gate slices
    cnn_size = hidden       # opt == 1  =>  cnnSize = hiddenSize
    ny = 4

    key = jax.random.PRNGKey(0)
    k_p, k_x, k_f = jax.random.split(key, 3)
    params = _init_params(k_p, nx=nx, cnn_size=cnn_size, hidden=hidden, ny=ny)

    x = jax.random.normal(k_x, (nt, ngrid, nx), dtype=jnp.float32)
    # Stand-in for Cnn1d(x1[k:k+ct]) sliding-window features (Cnn1d not in spec).
    cnn_feat = jax.random.normal(k_f, (pt, ngrid, cnn_size), dtype=jnp.float32)

    out_ref, hn_ref, cn_ref = _reference(x, cnn_feat, params, ct=ct)

    # f32 MXU path: tight tolerance vs the pure-JAX reference.
    out, hn, cn = lstm_cnn_forecast_forward(
        x, cnn_feat, params, ct=ct, batch_tile=8, time_chunk=16, use_bf16=False)
    jax.block_until_ready((out, hn, cn))
    assert jnp.allclose(out, out_ref, atol=5e-4, rtol=5e-4)
    assert jnp.allclose(hn, hn_ref, atol=5e-4, rtol=5e-4)
    assert jnp.allclose(cn, cn_ref, atol=5e-4, rtol=5e-4)

    # bf16-operand / f32-accumulate fast path (default): looser tolerance.
    out_b, hn_b, cn_b = lstm_cnn_forecast_forward(
        x, cnn_feat, params, ct=ct, batch_tile=8, time_chunk=16, use_bf16=True)
    jax.block_until_ready((out_b, hn_b, cn_b))
    assert jnp.allclose(out_b, out_ref, atol=5e-2, rtol=5e-2)
    assert jnp.allclose(hn_b, hn_ref, atol=5e-2, rtol=5e-2)
    assert jnp.allclose(cn_b, cn_ref, atol=5e-2, rtol=5e-2)

    print("KERNEL_OK")
</pallas_src>

<mosaic_0001>
module attributes {stable_mosaic.version = 11 : i64} {
  func.func @kernel(%arg0: i32, %arg1: i32, %arg2: memref<16x8x8xf32, #tpu.memory_space<vmem>>, %arg3: memref<16x8x128xf32, #tpu.memory_space<vmem>>, %arg4: memref<8x128xf32, #tpu.memory_space<vmem>>, %arg5: memref<128x128xf32, #tpu.memory_space<vmem>>, %arg6: memref<1x128xf32, #tpu.memory_space<vmem>>, %arg7: memref<256x512xf32, #tpu.memory_space<vmem>>, %arg8: memref<1x512xf32, #tpu.memory_space<vmem>>, %arg9: memref<128x4xf32, #tpu.memory_space<vmem>>, %arg10: memref<1x4xf32, #tpu.memory_space<vmem>>, %arg11: memref<16x8x4xf32, #tpu.memory_space<vmem>>, %arg12: memref<8x128xf32, #tpu.memory_space<vmem>>, %arg13: memref<8x128xf32, #tpu.memory_space<vmem>>, %arg14: memref<8x128xf32, #tpu.memory_space<vmem>>, %arg15: memref<8x128xf32, #tpu.memory_space<vmem>>, %arg16: memref<8x256xf32, #tpu.memory_space<vmem>>, %arg17: memref<16x8x128xf32, #tpu.memory_space<vmem>>) attributes {dimension_semantics = [#tpu.dimension_semantics<parallel>, #tpu.dimension_semantics<arbitrary>], iteration_bounds = array<i64: 2, 2>, scalar_prefetch = 0 : i64, scratch_operands = 4 : i64, tpu.core_type = #tpu.core_type<tc>, window_params = [{transform_indices = @transform_0, window_bounds = array<i64: 16, 8, 8>}, {transform_indices = @transform_1, window_bounds = array<i64: 16, 8, 128>}, {pipeline_mode = #tpu.pipeline_mode<synchronous>, transform_indices = @transform_2, window_bounds = array<i64: 8, 128>}, {pipeline_mode = #tpu.pipeline_mode<synchronous>, transform_indices = @transform_3, window_bounds = array<i64: 128, 128>}, {pipeline_mode = #tpu.pipeline_mode<synchronous>, transform_indices = @transform_4, window_bounds = array<i64: 1, 128>}, {pipeline_mode = #tpu.pipeline_mode<synchronous>, transform_indices = @transform_5, window_bounds = array<i64: 256, 512>}, {pipeline_mode = #tpu.pipeline_mode<synchronous>, transform_indices = @transform_6, window_bounds = array<i64: 1, 512>}, {pipeline_mode = #tpu.pipeline_mode<synchronous>, transform_indices = @transform_7, window_bounds = array<i64: 128, 4>}, {pipeline_mode = #tpu.pipeline_mode<synchronous>, transform_indices = @transform_8, window_bounds = array<i64: 1, 4>}, {transform_indices = @transform_9, window_bounds = array<i64: 16, 8, 4>}, {transform_indices = @transform_10, window_bounds = array<i64: 8, 128>}, {transform_indices = @transform_11, window_bounds = array<i64: 8, 128>}]} {
    %c0_i32 = arith.constant 0 : i32
    %0 = arith.cmpi eq, %arg1, %c0_i32 : i32
    %1 = arith.extui %0 : i1 to i32
    %c0_i32_0 = arith.constant 0 : i32
    %2 = arith.cmpi ne, %1, %c0_i32_0 : i32
    scf.if %2 {
      %cst_42 = arith.constant 0.000000e+00 : f32
      %36 = vector.broadcast %cst_42 : f32 to vector<8x128xf32>
      %c0_43 = arith.constant 0 : index
      %c0_44 = arith.constant 0 : index
      %37 = vector.load %arg14[%c0_43, %c0_44] : memref<8x128xf32, #tpu.memory_space<vmem>>, vector<8x128xf32>
      tpu.vector_store %arg14[%c0_43, %c0_44], %36 {strides = array<i32>} : memref<8x128xf32, #tpu.memory_space<vmem>>, vector<8x128xf32>,
      %cst_45 = arith.constant 0.000000e+00 : f32
      %38 = vector.broadcast %cst_45 : f32 to vector<8x128xf32>
      %c0_46 = arith.constant 0 : index
      %c0_47 = arith.constant 0 : index
      %39 = vector.load %arg15[%c0_46, %c0_47] : memref<8x128xf32, #tpu.memory_space<vmem>>, vector<8x128xf32>
      tpu.vector_store %arg15[%c0_46, %c0_47], %38 {strides = array<i32>} : memref<8x128xf32, #tpu.memory_space<vmem>>, vector<8x128xf32>,
      %cst_48 = arith.constant 0.000000e+00 : f32
      %40 = vector.broadcast %cst_48 : f32 to vector<8x128xf32>
      %c0_49 = arith.constant 0 : index
      %c128 = arith.constant 128 : index
      %41 = vector.load %arg16[%c0_49, %c128] : memref<8x256xf32, #tpu.memory_space<vmem>>, vector<8x128xf32>
      tpu.vector_store %arg16[%c0_49, %c128], %40 {strides = array<i32>} : memref<8x256xf32, #tpu.memory_space<vmem>>, vector<8x128xf32>,
    } else {
    }
    %c0 = arith.constant 0 : index
    %c0_1 = arith.constant 0 : index
    %c0_2 = arith.constant 0 : index
    %3 = vector.load %arg2[%c0, %c0_1, %c0_2] : memref<16x8x8xf32, #tpu.memory_space<vmem>>, vector<16x8x8xf32>
    %4 = vector.shape_cast %3 : vector<16x8x8xf32> to vector<128x8xf32>
    %c0_3 = arith.constant 0 : index
    %c0_4 = arith.constant 0 : index
    %c0_5 = arith.constant 0 : index
    %5 = vector.load %arg3[%c0_3, %c0_4, %c0_5] : memref<16x8x128xf32, #tpu.memory_space<vmem>>, vector<16x8x128xf32>
    %6 = vector.shape_cast %5 : vector<16x8x128xf32> to vector<128x128xf32>
    %c0_6 = arith.constant 0 : index
    %c0_7 = arith.constant 0 : index
    %7 = vector.load %arg4[%c0_6, %c0_7] : memref<8x128xf32, #tpu.memory_space<vmem>>, vector<8x128xf32>
    %cst = arith.constant dense<0.000000e+00> : vector<128x128xf32>
    %8 = tpu.matmul %4, %7, %cst {dimension_numbers = #tpu.dot_dimension_numbers<[1], [0], [0], [1], [0, 0, 1, 1], [], []>} : vector<128x8xf32>, vector<8x128xf32>, vector<128x128xf32> -> vector<128x128xf32>
    %c0_8 = arith.constant 0 : index
    %c0_9 = arith.constant 0 : index
    %9 = vector.load %arg5[%c0_8, %c0_9] : memref<128x128xf32, #tpu.memory_space<vmem>>, vector<128x128xf32>
    %cst_10 = arith.constant dense<0.000000e+00> : vector<128x128xf32>
    %10 = tpu.matmul %6, %9, %cst_10 {dimension_numbers = #tpu.dot_dimension_numbers<[1], [0], [0], [1], [0, 0, 1, 1], [], []>} : vector<128x128xf32>, vector<128x128xf32>, vector<128x128xf32> -> vector<128x128xf32>
    %11 = arith.addf %8, %10 : vector<128x128xf32>
    %c0_11 = arith.constant 0 : index
    %c0_12 = arith.constant 0 : index
    %12 = vector.load %arg6[%c0_11, %c0_12] : memref<1x128xf32, #tpu.memory_space<vmem>>, vector<1x128xf32>
    %13 = vector.broadcast %12 : vector<1x128xf32> to vector<128x128xf32>
    %14 = arith.addf %11, %13 : vector<128x128xf32>
    %cst_13 = arith.constant 0.000000e+00 : f32
    %15 = vector.broadcast %cst_13 : f32 to vector<128x128xf32>
    %16 = arith.maximumf %14, %15 : vector<128x128xf32>
    %17 = vector.shape_cast %16 : vector<128x128xf32> to vector<16x8x128xf32>
    %c0_14 = arith.constant 0 : index
    %c0_15 = arith.constant 0 : index
    %c0_16 = arith.constant 0 : index
    %18 = vector.load %arg17[%c0_14, %c0_15, %c0_16] : memref<16x8x128xf32, #tpu.memory_space<vmem>>, vector<16x8x128xf32>
    tpu.vector_store %arg17[%c0_14, %c0_15, %c0_16], %17 {strides = array<i32>} : memref<16x8x128xf32, #tpu.memory_space<vmem>>, vector<16x8x128xf32>,
    %c0_17 = arith.constant 0 : index
    %c0_18 = arith.constant 0 : index
    %19 = vector.load %arg14[%c0_17, %c0_18] : memref<8x128xf32, #tpu.memory_space<vmem>>, vector<8x128xf32>
    %c0_19 = arith.constant 0 : index
    %c0_20 = arith.constant 0 : index
    %20 = vector.load %arg15[%c0_19, %c0_20] : memref<8x128xf32, #tpu.memory_space<vmem>>, vector<8x128xf32>
    %c0_i32_21 = arith.constant 0 : i32
    %c16_i32 = arith.constant 16 : i32
    %21 = arith.addi %c0_i32_21, %c16_i32 : i32
    %c1_i32 = arith.constant 1 : i32
    %22:2 = scf.for %arg18 = %c0_i32_21 to %21 step %c1_i32 iter_args(%arg19 = %19, %arg20 = %20) -> (vector<8x128xf32>, vector<8x128xf32>)  : i32 {
      %36 = arith.index_cast %arg18 : i32 to index
      %c0_42 = arith.constant 0 : index
      %c0_43 = arith.constant 0 : index
      %37 = vector.load %arg17[%36, %c0_42, %c0_43] : memref<16x8x128xf32, #tpu.memory_space<vmem>>, vector<1x8x128xf32>
      %38 = vector.shape_cast %37 : vector<1x8x128xf32> to vector<8x128xf32>
      %c0_44 = arith.constant 0 : index
      %c0_45 = arith.constant 0 : index
      %39 = vector.load %arg16[%c0_44, %c0_45] : memref<8x256xf32, #tpu.memory_space<vmem>>, vector<8x128xf32>
      tpu.vector_store %arg16[%c0_44, %c0_45], %38 {strides = array<i32>} : memref<8x256xf32, #tpu.memory_space<vmem>>, vector<8x128xf32>,
      %c0_46 = arith.constant 0 : index
      %c0_47 = arith.constant 0 : index
      %40 = vector.load %arg16[%c0_46, %c0_47] : memref<8x256xf32, #tpu.memory_space<vmem>>, vector<8x256xf32>
      %c0_48 = arith.constant 0 : index
      %c0_49 = arith.constant 0 : index
      %41 = vector.load %arg7[%c0_48, %c0_49] : memref<256x512xf32, #tpu.memory_space<vmem>>, vector<256x512xf32>
      %cst_50 = arith.constant dense<0.000000e+00> : vector<8x512xf32>
      %42 = tpu.matmul %40, %41, %cst_50 {dimension_numbers = #tpu.dot_dimension_numbers<[1], [0], [0], [1], [0, 0, 1, 1], [], []>} : vector<8x256xf32>, vector<256x512xf32>, vector<8x512xf32> -> vector<8x512xf32>
      %c0_51 = arith.constant 0 : index
      %c0_52 = arith.constant 0 : index
      %43 = vector.load %arg8[%c0_51, %c0_52] : memref<1x512xf32, #tpu.memory_space<vmem>>, vector<1x512xf32>
      %44 = vector.broadcast %43 : vector<1x512xf32> to vector<8x512xf32>
      %45 = arith.addf %42, %44 : vector<8x512xf32>
      %46 = vector.extract_strided_slice %45 {offsets = [0, 0], sizes = [8, 128], strides = [1, 1]} : vector<8x512xf32> to vector<8x128xf32>
      %47 = arith.negf %46 : vector<8x128xf32>
      %48 = math.exp %47 : vector<8x128xf32>
      %cst_53 = arith.constant 1.000000e+00 : f32
      %49 = vector.broadcast %cst_53 : f32 to vector<8x128xf32>
      %50 = arith.addf %49, %48 : vector<8x128xf32>
      %51 = arith.divf %49, %50 : vector<8x128xf32>
      %52 = vector.extract_strided_slice %45 {offsets = [0, 128], sizes = [8, 128], strides = [1, 1]} : vector<8x512xf32> to vector<8x128xf32>
      %53 = arith.negf %52 : vector<8x128xf32>
      %54 = math.exp %53 : vector<8x128xf32>
      %cst_54 = arith.constant 1.000000e+00 : f32
      %55 = vector.broadcast %cst_54 : f32 to vector<8x128xf32>
      %56 = arith.addf %55, %54 : vector<8x128xf32>
      %57 = arith.divf %55, %56 : vector<8x128xf32>
      %58 = vector.extract_strided_slice %45 {offsets = [0, 256], sizes = [8, 128], strides = [1, 1]} : vector<8x512xf32> to vector<8x128xf32>
      %59 = math.tanh %58 : vector<8x128xf32>
      %60 = vector.extract_strided_slice %45 {offsets = [0, 384], sizes = [8, 128], strides = [1, 1]} : vector<8x512xf32> to vector<8x128xf32>
      %61 = arith.negf %60 : vector<8x128xf32>
      %62 = math.exp %61 : vector<8x128xf32>
      %cst_55 = arith.constant 1.000000e+00 : f32
      %63 = vector.broadcast %cst_55 : f32 to vector<8x128xf32>
      %64 = arith.addf %63, %62 : vector<8x128xf32>
      %65 = arith.divf %63, %64 : vector<8x128xf32>
      %66 = arith.mulf %57, %arg20 : vector<8x128xf32>
      %67 = arith.mulf %51, %59 : vector<8x128xf32>
      %68 = arith.addf %66, %67 : vector<8x128xf32>
      %69 = math.tanh %68 : vector<8x128xf32>
      %70 = arith.mulf %65, %69 : vector<8x128xf32>
      %c16_i32_56 = arith.constant 16 : i32
      %71 = arith.muli %arg1, %c16_i32_56 : i32
      %72 = arith.addi %71, %arg18 : i32
      %c20_i32 = arith.constant 20 : i32
      %73 = arith.cmpi slt, %72, %c20_i32 : i32
      %74 = arith.select %73, %68, %arg20 : vector<8x128xf32>
      %75 = arith.select %73, %70, %arg19 : vector<8x128xf32>
      %c0_57 = arith.constant 0 : index
      %c128 = arith.constant 128 : index
      %76 = vector.load %arg16[%c0_57, %c128] : memref<8x256xf32, #tpu.memory_space<vmem>>, vector<8x128xf32>
      tpu.vector_store %arg16[%c0_57, %c128], %75 {strides = array<i32>} : memref<8x256xf32, #tpu.memory_space<vmem>>, vector<8x128xf32>,
      %77 = arith.index_cast %arg18 : i32 to index
      %c0_58 = arith.constant 0 : index
      %c0_59 = arith.constant 0 : index
      %78 = vector.load %arg17[%77, %c0_58, %c0_59] : memref<16x8x128xf32, #tpu.memory_space<vmem>>, vector<1x8x128xf32>
      %79 = vector.shape_cast %78 : vector<1x8x128xf32> to vector<8x128xf32>
      %80 = vector.shape_cast %75 : vector<8x128xf32> to vector<1x8x128xf32>
      tpu.vector_store %arg17[%77, %c0_58, %c0_59], %80 {strides = array<i32>} : memref<16x8x128xf32, #tpu.memory_space<vmem>>, vector<1x8x128xf32>,
      scf.yield %75, %74 : vector<8x128xf32>, vector<8x128xf32>
    }
    %c16_i32_22 = arith.constant 16 : i32
    %c0_23 = arith.constant 0 : index
    %c0_24 = arith.constant 0 : index
    %23 = vector.load %arg14[%c0_23, %c0_24] : memref<8x128xf32, #tpu.memory_space<vmem>>, vector<8x128xf32>
    tpu.vector_store %arg14[%c0_23, %c0_24], %22#0 {strides = array<i32>} : memref<8x128xf32, #tpu.memory_space<vmem>>, vector<8x128xf32>,
    %c0_25 = arith.constant 0 : index
    %c0_26 = arith.constant 0 : index
    %24 = vector.load %arg15[%c0_25, %c0_26] : memref<8x128xf32, #tpu.memory_space<vmem>>, vector<8x128xf32>
    tpu.vector_store %arg15[%c0_25, %c0_26], %22#1 {strides = array<i32>} : memref<8x128xf32, #tpu.memory_space<vmem>>, vector<8x128xf32>,
    %c0_27 = arith.constant 0 : index
    %c0_28 = arith.constant 0 : index
    %25 = vector.load %arg12[%c0_27, %c0_28] : memref<8x128xf32, #tpu.memory_space<vmem>>, vector<8x128xf32>
    tpu.vector_store %arg12[%c0_27, %c0_28], %22#0 {strides = array<i32>} : memref<8x128xf32, #tpu.memory_space<vmem>>, vector<8x128xf32>,
    %c0_29 = arith.constant 0 : index
    %c0_30 = arith.constant 0 : index
    %26 = vector.load %arg13[%c0_29, %c0_30] : memref<8x128xf32, #tpu.memory_space<vmem>>, vector<8x128xf32>
    tpu.vector_store %arg13[%c0_29, %c0_30], %22#1 {strides = array<i32>} : memref<8x128xf32, #tpu.memory_space<vmem>>, vector<8x128xf32>,
    %c0_31 = arith.constant 0 : index
    %c0_32 = arith.constant 0 : index
    %c0_33 = arith.constant 0 : index
    %27 = vector.load %arg17[%c0_31, %c0_32, %c0_33] : memref<16x8x128xf32, #tpu.memory_space<vmem>>, vector<16x8x128xf32>
    %28 = vector.shape_cast %27 : vector<16x8x128xf32> to vector<128x128xf32>
    %c0_34 = arith.constant 0 : index
    %c0_35 = arith.constant 0 : index
    %29 = vector.load %arg9[%c0_34, %c0_35] : memref<128x4xf32, #tpu.memory_space<vmem>>, vector<128x4xf32>
    %cst_36 = arith.constant dense<0.000000e+00> : vector<128x4xf32>
    %30 = tpu.matmul %28, %29, %cst_36 {dimension_numbers = #tpu.dot_dimension_numbers<[1], [0], [0], [1], [0, 0, 1, 1], [], []>} : vector<128x128xf32>, vector<128x4xf32>, vector<128x4xf32> -> vector<128x4xf32>
    %c0_37 = arith.constant 0 : index
    %c0_38 = arith.constant 0 : index
    %31 = vector.load %arg10[%c0_37, %c0_38] : memref<1x4xf32, #tpu.memory_space<vmem>>, vector<1x4xf32>
    %32 = vector.broadcast %31 : vector<1x4xf32> to vector<128x4xf32>
    %33 = arith.addf %30, %32 : vector<128x4xf32>
    %34 = vector.shape_cast %33 : vector<128x4xf32> to vector<16x8x4xf32>
    %c0_39 = arith.constant 0 : index
    %c0_40 = arith.constant 0 : index
    %c0_41 = arith.constant 0 : index
    %35 = vector.load %arg11[%c0_39, %c0_40, %c0_41] : memref<16x8x4xf32, #tpu.memory_space<vmem>>, vector<16x8x4xf32>
    tpu.vector_store %arg11[%c0_39, %c0_40, %c0_41], %34 {strides = array<i32>} : memref<16x8x4xf32, #tpu.memory_space<vmem>>, vector<16x8x4xf32>,
    return
  }
  func.func @transform_0(%arg0: i32, %arg1: i32) -> (i32, i32, i32) {
    %c0_i32 = arith.constant 0 : i32
    %c0_i32_0 = arith.constant 0 : i32
    return %arg1, %arg0, %c0_i32 : i32, i32, i32
  }
  func.func @transform_1(%arg0: i32, %arg1: i32) -> (i32, i32, i32) {
    %c0_i32 = arith.constant 0 : i32
    %c0_i32_0 = arith.constant 0 : i32
    return %arg1, %arg0, %c0_i32 : i32, i32, i32
  }
  func.func @transform_2(%arg0: i32, %arg1: i32) -> (i32, i32) {
    %c0_i32 = arith.constant 0 : i32
    %c0_i32_0 = arith.constant 0 : i32
    %c0_i32_1 = arith.constant 0 : i32
    return %c0_i32, %c0_i32_0 : i32, i32
  }
  func.func @transform_3(%arg0: i32, %arg1: i32) -> (i32, i32) {
    %c0_i32 = arith.constant 0 : i32
    %c0_i32_0 = arith.constant 0 : i32
    %c0_i32_1 = arith.constant 0 : i32
    return %c0_i32, %c0_i32_0 : i32, i32
  }
  func.func @transform_4(%arg0: i32, %arg1: i32) -> (i32, i32) {
    %c0_i32 = arith.constant 0 : i32
    %c0_i32_0 = arith.constant 0 : i32
    %c0_i32_1 = arith.constant 0 : i32
    return %c0_i32, %c0_i32_0 : i32, i32
  }
  func.func @transform_5(%arg0: i32, %arg1: i32) -> (i32, i32) {
    %c0_i32 = arith.constant 0 : i32
    %c0_i32_0 = arith.constant 0 : i32
    %c0_i32_1 = arith.constant 0 : i32
    return %c0_i32, %c0_i32_0 : i32, i32
  }
  func.func @transform_6(%arg0: i32, %arg1: i32) -> (i32, i32) {
    %c0_i32 = arith.constant 0 : i32
    %c0_i32_0 = arith.constant 0 : i32
    %c0_i32_1 = arith.constant 0 : i32
    return %c0_i32, %c0_i32_0 : i32, i32
  }
  func.func @transform_7(%arg0: i32, %arg1: i32) -> (i32, i32) {
    %c0_i32 = arith.constant 0 : i32
    %c0_i32_0 = arith.constant 0 : i32
    %c0_i32_1 = arith.constant 0 : i32
    return %c0_i32, %c0_i32_0 : i32, i32
  }
  func.func @transform_8(%arg0: i32, %arg1: i32) -> (i32, i32) {
    %c0_i32 = arith.constant 0 : i32
    %c0_i32_0 = arith.constant 0 : i32
    %c0_i32_1 = arith.constant 0 : i32
    return %c0_i32, %c0_i32_0 : i32, i32
  }
  func.func @transform_9(%arg0: i32, %arg1: i32) -> (i32, i32, i32) {
    %c0_i32 = arith.constant 0 : i32
    %c0_i32_0 = arith.constant 0 : i32
    return %arg1, %arg0, %c0_i32 : i32, i32, i32
  }
  func.func @transform_10(%arg0: i32, %arg1: i32) -> (i32, i32) {
    %c0_i32 = arith.constant 0 : i32
    %c0_i32_0 = arith.constant 0 : i32
    return %arg0, %c0_i32 : i32, i32
  }
  func.func @transform_11(%arg0: i32, %arg1: i32) -> (i32, i32) {
    %c0_i32 = arith.constant 0 : i32
    %c0_i32_0 = arith.constant 0 : i32
    return %arg0, %c0_i32 : i32, i32
  }
}

</mosaic_0001>

<bundles_post_ra>
// kernel: tpu_custom_call.1
= control target key start
LH: loop header
LB: loop body
LE: loop exit
PB: predicated region body
PF: predicated region fallthrough
CT: control target
= control target key end

     0   :  { %s3458_s0 = inlined_call_operand.vmem [shape: f32[32,16,8], index: 0, kind: input, shape index: {}]   ;;  %s3459_s1 = inlined_call_operand.vmem [shape: f32[32,16,128], index: 1, kind: input, shape index: {}]   ;;  %s3460_s2 = inlined_call_operand.vmem [shape: f32[8,128], index: 2, kind: input, shape index: {}]   ;;  %s3461_s3 = inlined_call_operand.vmem [shape: f32[128,128], index: 3, kind: input, shape index: {}]   ;;  %s3462_s4 = inlined_call_operand.vmem [shape: f32[1,128], index: 4, kind: input, shape index: {}]   ;;  %s3463_s5 = inlined_call_operand.hbm [shape: f32[256,512], index: 5, kind: input, shape index: {}]   ;;  %s3464_s6 = inlined_call_operand.vmem [shape: f32[1,512], index: 6, kind: input, shape index: {}]   ;;  %s3465_s7 = inlined_call_operand.vmem [shape: f32[128,4], index: 7, kind: input, shape index: {}]   ;;  %s3466_s8 = inlined_call_operand.vmem [shape: f32[1,4], index: 8, kind: input, shape index: {}]   ;;  %s3467_s9 = inlined_call_operand.vmem [shape: f32[32,16,4], index: 9, kind: output, shape index: {0}]   ;;  %s3468_s10 = inlined_call_operand.hbm [shape: f32[16,128], index: 10, kind: output, shape index: {1}]   ;;  %s3469_s11 = inlined_call_operand.hbm [shape: f32[16,128], index: 11, kind: output, shape index: {2}]  }
   0x1   :  { %3487 = sst [smem:[#allocation28_spill]] %s3466_s8 }
   0x2   :  { %3488 = sst [smem:[#allocation29_spill]] %s3467_s9 }
   0x3   :  { %3489 = sst [smem:[#allocation30_spill]] %s3468_s10 }
   0x4   :  { %3490 = sst [smem:[#allocation31_spill]] %s3469_s11 }
   0x5   :  { %17 = vsyncpa [#allocation9], 0 }
   0x6   :  { %18 = vsyncpa [#allocation10], 0 }
   0x7   :  { %20 = vsyncpa [#allocation10 + $0x1], 0 }
   0x8   :  { %21 = vsyncpa [#allocation14], 0 }
   0x9   :  { %23 = vsyncpa [#allocation14 + $0x1], 0  ;;  %s2882_s17 = smov 0   ;;  %s2884_s18 = smov 0  }
   0xa   :  { %s2886_s19 = smov 0   ;;  %s2888_s20 = smov 0  }
   0xb   :  { %s2890_s21 = smov 0   ;;  %s2892_s22 = smov 0  }
   0xc   :  { %s2894_s23 = smov 0   ;;  %s2896_s24 = smov 0  }
   0xd   :  { %s2898_s25 = smov 0   ;;  %s2900_s26 = smov 0  }
   0xe LB: > { %3491 = sst [smem:[#allocation18_spill]] %s2766_s17  ;;  %s3473_s27 = sadd.s32 4294967295, %s2802_s26   ;;  %s2802_s26 = sphi %s2900_s26, %s29_s26   ;;  %s2798_s25 = sphi %s2898_s25, %s3543_s25   ;;  %s2794_s24 = sphi %s2896_s24, %s3542_s24   ;;  %s2790_s23 = sphi %s2894_s23, %s3541_s23   ;;  %s2786_s22 = sphi %s2892_s22, %s3540_s22   ;;  %s2782_s21 = sphi %s2890_s21, %s3539_s21   ;;  %s2778_s20 = sphi %s2888_s20, %s3538_s20   ;;  %s2774_s19 = sphi %s2886_s19, %s3532_s19   ;;  %s2770_s18 = sphi %s2884_s18, %s3537_s18   ;;  %s2766_s17 = sphi %s2882_s17, %s3536_s17  }
   0xf   : > { %3492 = sst [smem:[#allocation19_spill]] %s2774_s19  ;;  %s1971_s28 = sadd.s32 4294967294, %s2802_s26  }
  0x10   : > { %3493 = sst [smem:[#allocation20_spill]] %s2790_s23  ;;  %s38_s29 = sadd.s32 1, %s2794_s24 }
  0x11   : > { %s41_s30 = sadd.s32 1, %s2798_s25  ;;  %p39_p0 = scmp.ge.s32.totalorder %s38_s29, 2 }
  0x12   : > { %s50_s12 = sadd.s32 1, %s2782_s21  ;;  %p57_p1 = scmp.ne.s32.totalorder %s2782_s21, %s2778_s20 }
  0x13   : > { %p58_p2 = scmp.eq.s32.totalorder %s2802_s26, 0  ;;  %s3545_s29 = smov (%p39_p0, %s38_s29), 0 }
  0x14   : > { %3494 = sst [smem:[#allocation21_spill]] %s3545_s29  ;;  %s3547_s30 = smov (!%p39_p0, %s41_s30), %s2798_s25 }
  0x15   : > { %s45_s13 = ssub.s32 %s2794_s24, %s3545_s29  ;;  %p2945_p3 = por %p58_p2, %p57_p1 }
  0x16   : > { %p43_p4 = scmp.ge.s32.totalorder %s3547_s30, 2  ;;  %p264_p5 = scmp.eq.s32.totalorder %s3473_s27, 3 }
  0x17   : > { %s3495_s14 = scalar_select %p2945_p3, 1, 0 }
  0x18   : > { %s279_s15 = sadd.s32 1, %s2774_s19  ;;  %p289_p6 = scmp.ne.s32.totalorder %s2774_s19, %s2770_s18 }
  0x19   : > { %s3549_s30 = smov (%p43_p4, %s3547_s30), 0  ;;  %p2956_p7 = por %p264_p5, %p57_p1 }
  0x1a   : > { %3496 = sst [smem:[#allocation22_spill]] %s3549_s30  ;;  %p2960_p8 = por %p289_p6, %p264_p5 }
  0x1b   : > { %s3497_s16 = scalar_select %p2956_p7, 1, 0 }
  0x1c   : > { %s3499_s29 = scalar_select %p2960_p8, 1, 0 }
  0x1d   : > { %3498 = sst [smem:[#allocation23_spill]] %s3497_s16  ;;  %s46_s11 = ssub.s32 %s2798_s25, %s3549_s30 }
  0x1e   : > { %3500 = sst [smem:[#allocation24_spill]] %s3499_s29  ;;  %p295_p9 = scmp.ne.s32.totalorder %s2770_s18, %s2766_s17 }
  0x1f   : > { %s47_s10 = sor.u32 %s46_s11, %s45_s13  ;;  %p277_p10 = scmp.eq.s32.totalorder %s46_s11, 0 }
  0x20   : > { %p48_p11 = scmp.eq.s32.totalorder %s47_s10, 0  ;;  %p296_p12 = scmp.eq.s32.totalorder %s1971_s28, 3 }
  0x21   : > { %s2969_s27 = scalar_select %p277_p10, %s2774_s19, %s279_s15  }
  0x22   : > { %s2972_s9 = scalar_select %p48_p11, %s2782_s21, %s50_s12  }
  0x23   : > { %3501 = sst [smem:[#allocation25_spill]] %s2969_s27  ;;  %p2974_p13 = por %p296_p12, %p295_p9 }
  0x24   : > { %3502 = sst [smem:[#allocation26_spill]] %s2972_s9  ;;  %p1972_p0 = scmp.ge.s32.totalorder %s2802_s26, 1 }
  0x25   : > { %s3503_s23 = scalar_select %p2974_p13, 1, 0 }
  0x26   : > { %p329_p1 = scmp.lt.s32.totalorder %s2802_s26, 5  ;;  %s3505_s16 = sadd.s32 4294967295, %s2802_s26  }
  0x27   : > { %3504 = sst [smem:[#allocation27_spill]] %s3503_s23  ;;  %p2982_p2 = scmp.eq.s32.totalorder %s3505_s16, 0 }
  0x28   : > { %p2986_p4 = pnand %p1972_p0, %p329_p1  ;;  %s2816_s10 = smov [#allocation8]  }
  0x29   : > { %s3506_s8 = scalar_select %p2982_p2, 1, 0 }
  0x2a   : > { %s3507_s11 = scalar_select %p2986_p4, 1, 0 }
  0x2b   : > { %s350_s28 = sshll.u32 %s2816_s10, 4  ;;  %p2478_p5 = pneg %p2986_p4  ;;  %s351_s28 = int_to_ptr.vmem [resolvable:$true] %s350_s28 }
  0x2c   : > { %s2616_s16 = scalar_lea.hbm %s3463_s5, 16384 }
  0x2d   : > { %p2994_p6 = pnand %p2982_p2, %p2478_p5  ;;  %p2617_p9 = scmp.ne.s32.totalorder %s3463_s5, %s2616_s16 }
  0x2e   : > { %p2623_p0 = scmp.lt.u32.totalorder %s2616_s16, %s3463_s5 }
  0x2f   : > { %p2618_p10 = pneg %p2994_p6 }
  0x31   : > { %p2619_p11 = pnand %p2618_p10, %p2617_p9 }
  0x33   : > { %p2620_p12 = pneg %p2619_p11 }
  0x35   : > { %p2625_p1 = pnand %p2623_p0, %p2620_p12 }
  0x37   : > { %2628 = shalt.err (!%p2625_p1)
}
  0x38   : > { %s2629_s19 = scalar_lea.vmem %s351_s28, 16384  ;;  %p2637_p7 = scmp.lt.s32.totalorder %s351_s28, %s351_s28 }
  0x39   : > { %p2630_p5 = scmp.ne.s32.totalorder %s351_s28, %s2629_s19  ;;  %p2638_p2 = scmp.lt.s32.totalorder %s2629_s19, %s2629_s19 }
  0x3b   : > { %p2632_p13 = pnand %p2630_p5, %p2618_p10  ;;  %p2639_p4 = por %p2638_p2, %p2637_p7 }
  0x3d   : > { %p2633_p8 = pneg %p2632_p13 }
  0x3f   : > { %p2640_p3 = pnand %p2639_p4, %p2633_p8 }
  0x41   : > { %2643 = shalt.err (!%p2640_p3)
}
  0x42   : > { %s2817_s9 = smov 512   ;;  %s2818_s30 = smov 32  }
  0x43   : > { %2481 = dma.hbm_to_vmem [thread:$0]  (!%p2994_p6), %s3463_s5, 16384, %s351_s28, [#allocation9], %s2817_s9, %s2817_s9, %s2818_s30  }
  0x44   : > { %p1974_p9 = scmp.ge.s32.totalorder %s2802_s26, 4 }
  0x45   : > { %p3509_p11 = scmp.ne.s32.totalorder (!%p1974_p9), %s3495_s14, 0 }
  0x46   : > { %369 = sbr.rel (%p1974_p9) target bundleno = 106 (0x6a), region = 44 }
  0x4d   : > { %372 = sbr.rel (!%p3509_p11) target bundleno = 91 (0x5b), region = 48  ;;  %s374_s19 = sand.u32 (%p3509_p11), 1, %s2782_s21  }
  0x4e   : > { %s2024_s27 = sshll.u32 (%p3509_p11), %s2794_s24, 5  ;;  %s1975_s16 = sshll.u32 (%p3509_p11), %s374_s19, 7 }
  0x4f   : > { %s379_s10 = sadd.s32 (%p3509_p11), %s2798_s25, %s2024_s27  ;;  %s376_s28 = scalar_lea.vmem (%p3509_p11), [#allocation6], %s1975_s16 }
  0x50   : > { %s1978_s23 = sshll.u32 (%p3509_p11), %s379_s10, 3 }
  0x51   : > { %s3023_s29 = scalar_lea.vmem (%p3509_p11), %s3458_s0, %s1978_s23 }
  0x52   : > { %v439_v0 = vld [vmem:[%s3023_s29] sm:$0xff] (%p3509_p11)  ;;  %v441_v1 = vld [vmem:[%s3023_s29 + $0x10] sm:$0xff] (%p3509_p11) }
  0x53   : > { %v443_v2 = vld [vmem:[%s3023_s29 + $0x20] sm:$0xff] (%p3509_p11)  ;;  %440 = vst [vmem:[%s376_s28] sm:$0xff] (%p3509_p11), %v439_v0  ;;  %442 = vst [vmem:[%s376_s28 + $0x8] sm:$0xff] (%p3509_p11), %v441_v1  ;;  %v445_v3 = vld [vmem:[%s3023_s29 + $0x30] sm:$0xff] (%p3509_p11) }
  0x54   : > { %444 = vst [vmem:[%s376_s28 + $0x10] sm:$0xff] %v443_v2  ;;  %v447_v4 = vld [vmem:[%s3023_s29 + $0x40] sm:$0xff]  ;;  %v449_v5 = vld [vmem:[%s3023_s29 + $0x50] sm:$0xff]  ;;  %446 = vst [vmem:[%s376_s28 + $0x18] sm:$0xff] %v445_v3 }
  0x55   : > { %448 = vst [vmem:[%s376_s28 + $0x20] sm:$0xff] %v447_v4  ;;  %450 = vst [vmem:[%s376_s28 + $0x28] sm:$0xff] %v449_v5  ;;  %v451_v6 = vld [vmem:[%s3023_s29 + $0x60] sm:$0xff]  ;;  %v453_v7 = vld [vmem:[%s3023_s29 + $0x70] sm:$0xff] }
  0x56   : > { %v455_v8 = vld [vmem:[%s3023_s29 + $0x80] sm:$0xff]  ;;  %452 = vst [vmem:[%s376_s28 + $0x30] sm:$0xff] %v451_v6  ;;  %454 = vst [vmem:[%s376_s28 + $0x38] sm:$0xff] %v453_v7  ;;  %v457_v9 = vld [vmem:[%s3023_s29 + $0x90] sm:$0xff] }
  0x57   : > { %456 = vst [vmem:[%s376_s28 + $0x40] sm:$0xff] %v455_v8  ;;  %v459_v10 = vld [vmem:[%s3023_s29 + $0xa0] sm:$0xff]  ;;  %v461_v11 = vld [vmem:[%s3023_s29 + $0xb0] sm:$0xff]  ;;  %458 = vst [vmem:[%s376_s28 + $0x48] sm:$0xff] %v457_v9 }
  0x58   : > { %460 = vst [vmem:[%s376_s28 + $0x50] sm:$0xff] %v459_v10  ;;  %462 = vst [vmem:[%s376_s28 + $0x58] sm:$0xff] %v461_v11  ;;  %v463_v12 = vld [vmem:[%s3023_s29 + $0xc0] sm:$0xff]  ;;  %v465_v13 = vld [vmem:[%s3023_s29 + $0xd0] sm:$0xff] }
  0x59   : > { %v467_v14 = vld [vmem:[%s3023_s29 + $0xe0] sm:$0xff]  ;;  %464 = vst [vmem:[%s376_s28 + $0x60] sm:$0xff] %v463_v12  ;;  %466 = vst [vmem:[%s376_s28 + $0x68] sm:$0xff] %v465_v13  ;;  %v469_v15 = vld [vmem:[%s3023_s29 + $0xf0] sm:$0xff] }
  0x5a   : > { %468 = vst [vmem:[%s376_s28 + $0x70] sm:$0xff] %v467_v14  ;;  %470 = vst [vmem:[%s376_s28 + $0x78] sm:$0xff] %v469_v15 }
  0x5b PF: > { %p3510_p3 = scmp.ne.s32.totalorder %s3495_s14, 0 }
  0x5c   : > { %s478_s17 = sand.u32 (%p3510_p3), 1, %s2782_s21   ;;  %s2025_s23 = sshll.u32 (%p3510_p3), %s2794_s24, 5 }
  0x5d   : > { %476 = sbr.rel (!%p3510_p3) target bundleno = 106 (0x6a), region = 86  ;;  %s1979_s9 = sshll.u32 (%p3510_p3), %s478_s17, 7 }
  0x5e   : > { %s483_s30 = sadd.s32 (%p3510_p3), %s2798_s25, %s2025_s23  ;;  %s480_s29 = scalar_lea.vmem (%p3510_p3), [#allocation7], %s1979_s9 }
  0x5f   : > { %s1982_s13 = sshll.u32 (%p3510_p3), %s483_s30, 3 }
  0x60   : > { %s3049_s27 = scalar_lea.vmem (%p3510_p3), %s3459_s1, %s1982_s13 }
  0x61   : > { %v543_v16 = vld [vmem:[%s3049_s27] sm:$0xff] (%p3510_p3)  ;;  %v545_v17 = vld [vmem:[%s3049_s27 + $0x10] sm:$0xff] (%p3510_p3) }
  0x62   : > { %v547_v18 = vld [vmem:[%s3049_s27 + $0x20] sm:$0xff] (%p3510_p3)  ;;  %544 = vst [vmem:[%s480_s29] sm:$0xff] (%p3510_p3), %v543_v16  ;;  %546 = vst [vmem:[%s480_s29 + $0x8] sm:$0xff] (%p3510_p3), %v545_v17  ;;  %v549_v19 = vld [vmem:[%s3049_s27 + $0x30] sm:$0xff] (%p3510_p3) }
  0x63   : > { %548 = vst [vmem:[%s480_s29 + $0x10] sm:$0xff] (%p3510_p3), %v547_v18  ;;  %v551_v20 = vld [vmem:[%s3049_s27 + $0x40] sm:$0xff] (%p3510_p3)  ;;  %v553_v21 = vld [vmem:[%s3049_s27 + $0x50] sm:$0xff] (%p3510_p3)  ;;  %550 = vst [vmem:[%s480_s29 + $0x18] sm:$0xff] (%p3510_p3), %v549_v19 }
  0x64   : > { %552 = vst [vmem:[%s480_s29 + $0x20] sm:$0xff] %v551_v20  ;;  %554 = vst [vmem:[%s480_s29 + $0x28] sm:$0xff] %v553_v21  ;;  %v555_v22 = vld [vmem:[%s3049_s27 + $0x60] sm:$0xff]  ;;  %v557_v23 = vld [vmem:[%s3049_s27 + $0x70] sm:$0xff] }
  0x65   : > { %v559_v24 = vld [vmem:[%s3049_s27 + $0x80] sm:$0xff]  ;;  %556 = vst [vmem:[%s480_s29 + $0x30] sm:$0xff] %v555_v22  ;;  %558 = vst [vmem:[%s480_s29 + $0x38] sm:$0xff] %v557_v23  ;;  %v561_v25 = vld [vmem:[%s3049_s27 + $0x90] sm:$0xff] }
  0x66   : > { %560 = vst [vmem:[%s480_s29 + $0x40] sm:$0xff] %v559_v24  ;;  %v563_v26 = vld [vmem:[%s3049_s27 + $0xa0] sm:$0xff]  ;;  %v565_v27 = vld [vmem:[%s3049_s27 + $0xb0] sm:$0xff]  ;;  %562 = vst [vmem:[%s480_s29 + $0x48] sm:$0xff] %v561_v25 }
  0x67   : > { %564 = vst [vmem:[%s480_s29 + $0x50] sm:$0xff] %v563_v26  ;;  %566 = vst [vmem:[%s480_s29 + $0x58] sm:$0xff] %v565_v27  ;;  %v567_v28 = vld [vmem:[%s3049_s27 + $0xc0] sm:$0xff]  ;;  %v569_v29 = vld [vmem:[%s3049_s27 + $0xd0] sm:$0xff] }
  0x68   : > { %v571_v30 = vld [vmem:[%s3049_s27 + $0xe0] sm:$0xff]  ;;  %568 = vst [vmem:[%s480_s29 + $0x60] sm:$0xff] %v567_v28  ;;  %570 = vst [vmem:[%s480_s29 + $0x68] sm:$0xff] %v569_v29  ;;  %v573_v31 = vld [vmem:[%s3049_s27 + $0xf0] sm:$0xff] }
  0x69   : > { %572 = vst [vmem:[%s480_s29 + $0x70] sm:$0xff] %v571_v30  ;;  %574 = vst [vmem:[%s480_s29 + $0x78] sm:$0xff] %v573_v31 }
  0x6a PF: > { %p3511_p7 = scmp.ne.s32.totalorder %s3507_s11, 0 }
  0x6b   : > { %s586_s14 = sand.u32 (!%p3511_p7), 1, %s2778_s20   ;;  %p3512_p8 = scmp.ne.s32.totalorder (!%p3511_p7), %s3506_s8, 0 }
  0x6c   : > { %583 = sbr.rel (%p3511_p7) target bundleno = 1061 (0x425), region = 124  ;;  %s1984_s16 = sshll.u32 (!%p3511_p7), %s586_s14, 7 }
  0x6d   : > { %s3070_s10 = scalar_lea.vmem (!%p3511_p7), [#allocation6], %s1984_s16  ;;  %s3072_s12 = scalar_lea.vmem (!%p3511_p7), [#allocation7], %s1984_s16 }
  0x73   : > { %2753 = dma.done.wait (%p3512_p8), [#allocation9], 16384  }
  0x74   : > { %2755 = vsyncadd (%p3512_p8), [#allocation9], 4294950912  ;;  %s3079_s28 = sand.u32 1, %s2770_s18   ;;  %s3082_s11 = scalar_lea.vmem [#allocation11], %s1984_s16 }
  0x75   : > { %s1988_s17 = sshll.u32 %s3079_s28, 3  ;;  %p1990_p13 = scmp.ne.s32.totalorder %s2786_s22, 0 }
  0x76   : > { %s3084_s23 = scalar_lea.vmem [#allocation12], %s1988_s17  ;;  %s3086_s20 = scalar_lea.vmem [#allocation13], %s1988_s17  ;;  %v2819_v32 = vmov (!%p1990_p13), 0.0  }
  0x77   : > { %655 = sbr.rel (%p1990_p13) target bundleno = 126 (0x7e), region = 140  ;;  %656 = vst [vmem:[#allocation2] sm:$0xff] (!%p1990_p13), %v2819_v32  ;;  %657 = vst [vmem:[#allocation3] sm:$0xff] (!%p1990_p13), %v2819_v32 }
  0x78   : > { %658 = vst [vmem:[#allocation4 + $0x8] sm:$0xff] (!%p1990_p13), %v2819_v32 }
  0x7e PF: > { %v692_v33 = vld [vmem:[%s3461_s3] sm:$0xff]  ;;  %v693_v34 = vld [vmem:[%s3461_s3 + $0x8] sm:$0xff]  ;;  %v694_v35 = vld [vmem:[%s3461_s3 + $0x10] sm:$0xff]  ;;  %vm853_vm0 = vcmask 64512   ;;  %s3231_s9 = smov 0  }
  0x7f   : > { %v2246_v36 = vpack.c.bf16 %v693_v34, %v692_v33  ;;  %v695_v37 = vld [vmem:[%s3461_s3 + $0x18] sm:$0xff]  ;;  %v696_v39 = vld [vmem:[%s3461_s3 + $0x20] sm:$0xff]  ;;  %v697_v40 = vld [vmem:[%s3461_s3 + $0x28] sm:$0xff] }
  0x80   : > { %v2250_v38 = vpack.c.bf16 %v695_v37, %v694_v35  ;;  %v2254_v41 = vpack.c.bf16 %v697_v40, %v696_v39  ;;  %v698_v42 = vld [vmem:[%s3461_s3 + $0x30] sm:$0xff]  ;;  %v691_v43 = vld [vmem:[%s3460_s2] sm:$0xff]  ;;  %v699_v45 = vld [vmem:[%s3461_s3 + $0x38] sm:$0xff] }
  0x81   : > { %2247 = vmatprep.subr.bf16.mxu1 %v2246_v36  ;;  %v659_v44 = vld [vmem:[%s3070_s10] sm:$0xff]  ;;  %2164 = vmatprep.subr.mxu0 %v691_v43  ;;  %v660_v47 = vld [vmem:[%s3070_s10 + $0x8] sm:$0xff]  ;;  %v661_v48 = vld [vmem:[%s3070_s10 + $0x10] sm:$0xff]  ;;  %v2258_v49 = vpack.c.bf16 %v699_v45, %v698_v42 }
  0x82   : > { %2249 = vmatpush3.bf16.msra.mxu1 %v2246_v36  ;;  %2166 = vmatprep.mubr.msk.f32.mxu0 %vm853_vm0, %v659_v44  ;;  %v675_v46 = vld [vmem:[%s3072_s12] sm:$0xff]  ;;  %v662_v50 = vld [vmem:[%s3070_s10 + $0x18] sm:$0xff]  ;;  %v701_v52 = vld [vmem:[%s3461_s3 + $0x48] sm:$0xff] }
  0x83   : > { %2251 = vmatprep.subr.bf16.mxu1 %v2250_v38  ;;  %2165 = vmatpush3.msra.mxu0 %v691_v43  ;;  %v700_v51 = vld [vmem:[%s3461_s3 + $0x40] sm:$0xff]  ;;  %v664_v55 = vld [vmem:[%s3070_s10 + $0x28] sm:$0xff]  ;;  %v702_v56 = vld [vmem:[%s3461_s3 + $0x50] sm:$0xff] }
  0x84   : > { %2140 = vmatprep.mubr.f32.mxu1 %v675_v46  ;;  %2167 = vmatmul.mubr.msk.f32.vlgmr.msra.gmra.mrb[0].mxu0 %vm853_vm0, %v660_v47  ;;  %v663_v53 = vld [vmem:[%s3070_s10 + $0x20] sm:$0xff]  ;;  %v2262_v54 = vpack.c.bf16 %v701_v52, %v700_v51  ;;  %v703_v57 = vld [vmem:[%s3461_s3 + $0x58] sm:$0xff]  ;;  %v665_v58 = vld [vmem:[%s3070_s10 + $0x30] sm:$0xff] }
  0x85   : > { %2169 = vmatprep.mubr.msk.f32.mxu0 %vm853_vm0, %v661_v48  ;;  %v2266_v59 = vpack.c.bf16 %v703_v57, %v702_v56  ;;  %v666_v60 = vld [vmem:[%s3070_s10 + $0x38] sm:$0xff]  ;;  %v704_v61 = vld [vmem:[%s3461_s3 + $0x60] sm:$0xff]  ;;  %v705_v62 = vld [vmem:[%s3461_s3 + $0x68] sm:$0xff] }
  0x86   : > { %2253 = vmatpush3.bf16.msra.mxu1 %v2250_v38  ;;  %v667_v63 = vld [vmem:[%s3070_s10 + $0x40] sm:$0xff]  ;;  %v2270_v0 = vpack.c.bf16 %v705_v62, %v704_v61  ;;  %v668_v1 = vld [vmem:[%s3070_s10 + $0x48] sm:$0xff]  ;;  %v706_v2 = vld [vmem:[%s3461_s3 + $0x70] sm:$0xff] }
  0x87   : > { %2255 = vmatprep.subr.bf16.mxu1 %v2254_v41  ;;  %v707_v3 = vld [vmem:[%s3461_s3 + $0x78] sm:$0xff]  ;;  %v669_v4 = vld [vmem:[%s3070_s10 + $0x50] sm:$0xff]  ;;  %v671_v7 = vld [vmem:[%s3070_s10 + $0x60] sm:$0xff] }
  0x88   : > { %2170 = vmatmul.mubr.msk.f32.gmra.mrb[2].mxu0 %vm853_vm0, %v662_v50  ;;  %v2274_v5 = vpack.c.bf16 %v707_v3, %v706_v2  ;;  %v670_v6 = vld [vmem:[%s3070_s10 + $0x58] sm:$0xff]  ;;  %v672_v8 = vld [vmem:[%s3070_s10 + $0x68] sm:$0xff]  ;;  %v673_v9 = vld [vmem:[%s3070_s10 + $0x70] sm:$0xff] }
  0x89   : > { %2172 = vmatprep.mubr.msk.f32.mxu0 %vm853_vm0, %v663_v53  ;;  %v676_v10 = vld [vmem:[%s3072_s12 + $0x8] sm:$0xff]  ;;  %v677_v11 = vld [vmem:[%s3072_s12 + $0x10] sm:$0xff]  ;;  %v674_v12 = vld [vmem:[%s3070_s10 + $0x78] sm:$0xff] }
  0x8a   : > { %2257 = vmatpush3.bf16.msra.mxu1 %v2254_v41  ;;  %v678_v13 = vld [vmem:[%s3072_s12 + $0x18] sm:$0xff]  ;;  %v679_v14 = vld [vmem:[%s3072_s12 + $0x20] sm:$0xff]  ;;  %v680_v15 = vld [vmem:[%s3072_s12 + $0x28] sm:$0xff] }
  0x8b   : > { %2259 = vmatprep.subr.bf16.mxu1 %v2258_v49  ;;  %v681_v16 = vld [vmem:[%s3072_s12 + $0x30] sm:$0xff]  ;;  %v682_v17 = vld [vmem:[%s3072_s12 + $0x38] sm:$0xff]  ;;  %v683_v18 = vld [vmem:[%s3072_s12 + $0x40] sm:$0xff] }
  0x8c   : > { %2173 = vmatmul.mubr.msk.f32.gmra.mrb[4].mxu0 %vm853_vm0, %v664_v55  ;;  %v684_v19 = vld [vmem:[%s3072_s12 + $0x48] sm:$0xff]  ;;  %v685_v20 = vld [vmem:[%s3072_s12 + $0x50] sm:$0xff]  ;;  %v686_v21 = vld [vmem:[%s3072_s12 + $0x58] sm:$0xff] }
  0x8d   : > { %2175 = vmatprep.mubr.msk.f32.mxu0 %vm853_vm0, %v665_v58  ;;  %v687_v22 = vld [vmem:[%s3072_s12 + $0x60] sm:$0xff]  ;;  %v688_v23 = vld [vmem:[%s3072_s12 + $0x68] sm:$0xff]  ;;  %v689_v24 = vld [vmem:[%s3072_s12 + $0x70] sm:$0xff] }
  0x8e   : > { %2261 = vmatpush3.bf16.msra.mxu1 %v2258_v49  ;;  %v690_v25 = vld [vmem:[%s3072_s12 + $0x78] sm:$0xff]  ;;  %v3188_v26 = vld [vmem:[#allocation2] sm:$0xff]   ;;  %v3190_v27 = vld [vmem:[#allocation3] sm:$0xff]  }
  0x8f   : > { %2263 = vmatprep.subr.bf16.mxu1 %v2262_v54  ;;  %v3199_v43 = vld [vmem:[%s3462_s4] ss:$0 sm:$0xff] }
  0x90   : > { %2176 = vmatmul.mubr.msk.f32.gmra.mrb[6].mxu0 %vm853_vm0, %v666_v60 }
  0x91   : > { %2178 = vmatprep.mubr.msk.f32.mxu0 %vm853_vm0, %v667_v63 }
  0x92   : > { %2265 = vmatpush3.bf16.msra.mxu1 %v2262_v54 }
  0x93   : > { %2267 = vmatprep.subr.bf16.mxu1 %v2266_v59 }
  0x94   : > { %2179 = vmatmul.mubr.msk.f32.gmra.mrb[8].mxu0 %vm853_vm0, %v668_v1 }
  0x95   : > { %2181 = vmatprep.mubr.msk.f32.mxu0 %vm853_vm0, %v669_v4 }
  0x96   : > { %2269 = vmatpush3.bf16.msra.mxu1 %v2266_v59 }
  0x97   : > { %2271 = vmatprep.subr.bf16.mxu1 %v2270_v0 }
  0x98   : > { %2182 = vmatmul.mubr.msk.f32.gmra.mrb[10].mxu0 %vm853_vm0, %v670_v6 }
  0x99   : > { %2184 = vmatprep.mubr.msk.f32.mxu0 %vm853_vm0, %v671_v7 }
  0x9a   : > { %2273 = vmatpush3.bf16.msra.mxu1 %v2270_v0 }
  0x9b   : > { %2275 = vmatprep.subr.bf16.mxu1 %v2274_v5 }
  0x9c   : > { %2185 = vmatmul.mubr.msk.f32.gmra.mrb[12].mxu0 %vm853_vm0, %v672_v8 }
  0x9d   : > { %2187 = vmatprep.mubr.msk.f32.mxu0 %vm853_vm0, %v673_v9 }
  0x9e   : > { %2277 = vmatpush3.bf16.msra.mxu1 %v2274_v5 }
  0xa0   : > { %2188 = vmatmul.mubr.msk.f32.gmra.mrb[14].mxu0 %vm853_vm0, %v674_v12 }
  0xa1   : > { %2141 = vmatmul.mubr.f32.vlgmr.msra.gmra.mrb[0].mxu1 %v676_v10 }
  0xa2   : > { %2143 = vmatprep.mubr.f32.mxu1 %v677_v11 }
  0xa5   : > { %2144 = vmatmul.mubr.f32.gmra.mrb[2].mxu1 %v678_v13 }
  0xa6   : > { %2146 = vmatprep.mubr.f32.mxu1 %v679_v14 }
  0xa9   : > { %2147 = vmatmul.mubr.f32.gmra.mrb[4].mxu1 %v680_v15 }
  0xaa   : > { %2149 = vmatprep.mubr.f32.mxu1 %v681_v16 }
  0xad   : > { %2150 = vmatmul.mubr.f32.gmra.mrb[6].mxu1 %v682_v17 }
  0xae   : > { %2152 = vmatprep.mubr.f32.mxu1 %v683_v18 }
  0xb1   : > { %2153 = vmatmul.mubr.f32.gmra.mrb[8].mxu1 %v684_v19 }
  0xb2   : > { %2155 = vmatprep.mubr.f32.mxu1 %v685_v20 }
  0xb5   : > { %2156 = vmatmul.mubr.f32.gmra.mrb[10].mxu1 %v686_v21 }
  0xb6   : > { %2158 = vmatprep.mubr.f32.mxu1 %v687_v22 }
  0xb9   : > { %2159 = vmatmul.mubr.f32.gmra.mrb[12].mxu1 %v688_v23 }
  0xba   : > { %2161 = vmatprep.mubr.f32.mxu1 %v689_v24 }
  0xbd   : > { %2162 = vmatmul.mubr.f32.gmra.mrb[14].mxu1 %v690_v25 }
 0x157   : > { %v2168_v28 = vpop.f32.mrb[0].mxu0 }
 0x158   : > { %v968_v29 = vpop.f32.mrb[1].mxu0 }
 0x15b   : > { %v2171_v30 = vpop.f32.mrb[2].mxu0 }
 0x15c   : > { %v978_v31 = vpop.f32.mrb[3].mxu0 }
 0x15f   : > { %v2174_v32 = vpop.f32.mrb[4].mxu0 }
 0x160   : > { %v988_v33 = vpop.f32.mrb[5].mxu0 }
 0x163   : > { %v2177_v34 = vpop.f32.mrb[6].mxu0 }
 0x164   : > { %v998_v35 = vpop.f32.mrb[7].mxu0 }
 0x167   : > { %v2180_v36 = vpop.f32.mrb[8].mxu0 }
 0x168   : > { %v1008_v37 = vpop.f32.mrb[9].mxu0 }
 0x16b   : > { %v2183_v38 = vpop.f32.mrb[10].mxu0 }
 0x16c   : > { %v1018_v39 = vpop.f32.mrb[11].mxu0 }
 0x16f   : > { %v3192_v40 = vpop.f32.mrb[12].mxu0 }
 0x170   : > { %v3194_v41 = vpop.f32.mrb[13].mxu0 }
 0x173   : > { %v3201_v46 = vpop.f32.mrb[14].mxu0 }
 0x174   : > { %v2142_v42 = vpop.f32.mrb[0].mxu1  ;;  %v3203_v48 = vpop.f32.mrb[15].mxu0 }
 0x175   : > { %v974_v44 = vadd.f32 %v2168_v28, %v2142_v42  ;;  %v774_v45 = vpop.f32.mrb[1].mxu1 }
 0x176   : > { %v969_v47 = vadd.f32 %v968_v29, %v774_v45 }
 0x177   : > { %v1055_v49 = vadd.f32 %v3199_v43, %v974_v44 }
 0x178   : > { %v1054_v50 = vadd.f32 %v3199_v43, %v969_v47  ;;  %v2145_v51 = vpop.f32.mrb[2].mxu1 }
 0x179   : > { %v1071_v52 = vmax.f32 %v1055_v49, 0.0  ;;  %v984_v53 = vadd.f32 %v2171_v30, %v2145_v51  ;;  %v784_v54 = vpop.f32.mrb[3].mxu1 }
 0x17a   : > { %v1070_v55 = vmax.f32 %v1054_v50, 0.0  ;;  %v979_v56 = vadd.f32 %v978_v31, %v784_v54 }
 0x17b   : > { %1087 = vst [vmem:[#allocation5 + $0x8] sm:$0xff] %v1071_v52  ;;  %v1057_v57 = vadd.f32 %v3199_v43, %v984_v53 }
 0x17c   : > { %1086 = vst [vmem:[#allocation5] sm:$0xff] %v1070_v55  ;;  %v1056_v58 = vadd.f32 %v3199_v43, %v979_v56  ;;  %v2148_v59 = vpop.f32.mrb[4].mxu1 }
 0x17d   : > { %v1073_v60 = vmax.f32 %v1057_v57, 0.0  ;;  %v994_v61 = vadd.f32 %v2174_v32, %v2148_v59  ;;  %v794_v62 = vpop.f32.mrb[5].mxu1 }
 0x17e   : > { %v1072_v63 = vmax.f32 %v1056_v58, 0.0  ;;  %v989_v0 = vadd.f32 %v988_v33, %v794_v62 }
 0x17f   : > { %1089 = vst [vmem:[#allocation5 + $0x18] sm:$0xff] %v1073_v60  ;;  %v1059_v1 = vadd.f32 %v3199_v43, %v994_v61 }
 0x180   : > { %1088 = vst [vmem:[#allocation5 + $0x10] sm:$0xff] %v1072_v63  ;;  %v1058_v2 = vadd.f32 %v3199_v43, %v989_v0  ;;  %v2151_v3 = vpop.f32.mrb[6].mxu1 }
 0x181   : > { %v1075_v4 = vmax.f32 %v1059_v1, 0.0  ;;  %v1004_v5 = vadd.f32 %v2177_v34, %v2151_v3  ;;  %v804_v6 = vpop.f32.mrb[7].mxu1 }
 0x182   : > { %v1074_v7 = vmax.f32 %v1058_v2, 0.0  ;;  %v999_v8 = vadd.f32 %v998_v35, %v804_v6 }
 0x183   : > { %1091 = vst [vmem:[#allocation5 + $0x28] sm:$0xff] %v1075_v4  ;;  %v1061_v9 = vadd.f32 %v3199_v43, %v1004_v5 }
 0x184   : > { %1090 = vst [vmem:[#allocation5 + $0x20] sm:$0xff] %v1074_v7  ;;  %v1060_v10 = vadd.f32 %v3199_v43, %v999_v8  ;;  %v2154_v11 = vpop.f32.mrb[8].mxu1 }
 0x185   : > { %v1077_v12 = vmax.f32 %v1061_v9, 0.0  ;;  %v1014_v13 = vadd.f32 %v2180_v36, %v2154_v11  ;;  %v814_v14 = vpop.f32.mrb[9].mxu1 }
 0x186   : > { %v1076_v15 = vmax.f32 %v1060_v10, 0.0  ;;  %v1009_v16 = vadd.f32 %v1008_v37, %v814_v14 }
 0x187   : > { %1093 = vst [vmem:[#allocation5 + $0x38] sm:$0xff] %v1077_v12  ;;  %v1063_v17 = vadd.f32 %v3199_v43, %v1014_v13 }
 0x188   : > { %1092 = vst [vmem:[#allocation5 + $0x30] sm:$0xff] %v1076_v15  ;;  %v1062_v18 = vadd.f32 %v3199_v43, %v1009_v16  ;;  %v2157_v19 = vpop.f32.mrb[10].mxu1 }
 0x189   : > { %v1079_v20 = vmax.f32 %v1063_v17, 0.0  ;;  %v1024_v21 = vadd.f32 %v2183_v38, %v2157_v19  ;;  %v824_v22 = vpop.f32.mrb[11].mxu1 }
 0x18a   : > { %v1078_v23 = vmax.f32 %v1062_v18, 0.0  ;;  %v1019_v24 = vadd.f32 %v1018_v39, %v824_v22 }
 0x18b   : > { %1095 = vst [vmem:[#allocation5 + $0x48] sm:$0xff] %v1079_v20  ;;  %v1065_v25 = vadd.f32 %v3199_v43, %v1024_v21 }
 0x18c   : > { %1094 = vst [vmem:[#allocation5 + $0x40] sm:$0xff] %v1078_v23  ;;  %v1064_v28 = vadd.f32 %v3199_v43, %v1019_v24  ;;  %v2160_v29 = vpop.f32.mrb[12].mxu1 }
 0x18d   : > { %v1081_v30 = vmax.f32 %v1065_v25, 0.0  ;;  %v1034_v31 = vadd.f32 %v3192_v40, %v2160_v29  ;;  %v834_v32 = vpop.f32.mrb[13].mxu1 }
 0x18e   : > { %v1080_v33 = vmax.f32 %v1064_v28, 0.0  ;;  %v1029_v34 = vadd.f32 %v3194_v41, %v834_v32 }
 0x18f   : > { %1097 = vst [vmem:[#allocation5 + $0x58] sm:$0xff] %v1081_v30  ;;  %v1067_v35 = vadd.f32 %v3199_v43, %v1034_v31 }
 0x190   : > { %1096 = vst [vmem:[#allocation5 + $0x50] sm:$0xff] %v1080_v33  ;;  %v1066_v36 = vadd.f32 %v3199_v43, %v1029_v34  ;;  %v2163_v37 = vpop.f32.mrb[14].mxu1 }
 0x191   : > { %v1083_v38 = vmax.f32 %v1067_v35, 0.0  ;;  %v1044_v39 = vadd.f32 %v3201_v46, %v2163_v37  ;;  %v844_v42 = vpop.f32.mrb[15].mxu1 }
 0x192   : > { %v1082_v44 = vmax.f32 %v1066_v36, 0.0  ;;  %v1039_v45 = vadd.f32 %v3203_v48, %v844_v42 }
 0x193   : > { %1099 = vst [vmem:[#allocation5 + $0x68] sm:$0xff] %v1083_v38  ;;  %v1069_v40 = vadd.f32 %v3199_v43, %v1044_v39 }
 0x194   : > { %1098 = vst [vmem:[#allocation5 + $0x60] sm:$0xff] %v1082_v44  ;;  %v1068_v41 = vadd.f32 %v3199_v43, %v1039_v45 }
 0x195   : > { %v1085_v47 = vmax.f32 %v1069_v40, 0.0 }
 0x196   : > { %v1084_v49 = vmax.f32 %v1068_v41, 0.0 }
 0x197   : > { %1101 = vst [vmem:[#allocation5 + $0x78] sm:$0xff] %v1085_v47 }
 0x198   : > { %1100 = vst [vmem:[#allocation5 + $0x70] sm:$0xff] %v1084_v49 }
 0x199 LB: >> { %v1119_v43 = vld [vmem:[#allocation8 + $0x8] sm:$0xff]  ;;  %v1118_v48 = vld [vmem:[#allocation8] sm:$0xff]  ;;  %v1121_v1 = vld [vmem:[#allocation8 + $0x18] sm:$0xff]  ;;  %s2008_s30 = sshll.u32 %s2814_s9, 3  ;;  %s2012_s27 = sshll.u32 %s2786_s22, 4  ;;  %s2814_s9 = sphi %s3231_s9, %s1109_s9   ;;  %v2810_v26 = vphi %v3188_v26, %v3514_v26   ;;  %v2806_v27 = vphi %v3190_v27, %v3513_v27  }
 0x19a   : >> { %v1123_v46 = vld [vmem:[#allocation8 + $0x28] sm:$0xff]  ;;  %v1122_v51 = vld [vmem:[#allocation8 + $0x20] sm:$0xff]  ;;  %v1125_v2 = vld [vmem:[#allocation8 + $0x38] sm:$0xff]  ;;  %s3243_s13 = scalar_lea.vmem [#allocation5], %s2008_s30  ;;  %s1435_s29 = sadd.s32 %s2814_s9, %s2012_s27 }
 0x19b   : >> { %v2278_v50 = vpack.c.bf16 %v1123_v46, %v1119_v43  ;;  %v1127_v52 = vld [vmem:[#allocation8 + $0x48] sm:$0xff]  ;;  %v2280_v54 = vpack.c.bf16 %v1122_v51, %v1118_v48  ;;  %v1126_v56 = vld [vmem:[#allocation8 + $0x40] sm:$0xff]  ;;  %v2342_v4 = vpack.c.bf16 %v1125_v2, %v1121_v1  ;;  %v1120_v5 = vld [vmem:[#allocation8 + $0x10] sm:$0xff]  ;;  %p1436_p2 = scmp.lt.s32.totalorder %s1435_s29, 20  ;;  %s1109_s9 = sadd.s32 1, %s2814_s9  }
 0x19c   : >> { %v1131_v53 = vld [vmem:[#allocation8 + $0x68] sm:$0xff]  ;;  %v1130_v57 = vld [vmem:[#allocation8 + $0x60] sm:$0xff]  ;;  %v1124_v6 = vld [vmem:[#allocation8 + $0x30] sm:$0xff]  ;;  %p1106_p4 = scmp.ge.s32.totalorder %s1109_s9, 16  }
 0x19d   : >> { %v2282_v55 = vpack.c.bf16 %v1131_v53, %v1127_v52  ;;  %v1135_v58 = vld [vmem:[#allocation8 + $0x88] sm:$0xff]  ;;  %2279 = vmatprep.subr.bf16.mxu0 %v2278_v50  ;;  %v2284_v60 = vpack.c.bf16 %v1130_v57, %v1126_v56  ;;  %v1134_v61 = vld [vmem:[#allocation8 + $0x80] sm:$0xff]  ;;  %v2344_v7 = vpack.c.bf16 %v1124_v6, %v1120_v5  ;;  %2343 = vmatprep.subr.bf16.mxu1 %v2342_v4  ;;  %v1129_v9 = vld [vmem:[#allocation8 + $0x58] sm:$0xff]  ;;  %s1437_s14 = scalar_select %p1436_p2, 1, 0 }
 0x19e   : >> { %v1139_v59 = vld [vmem:[#allocation8 + $0xa8] sm:$0xff]  ;;  %2281 = vmatpush1.bf16.msra.mxu0 %v2280_v54  ;;  %v1138_v62 = vld [vmem:[#allocation8 + $0xa0] sm:$0xff]  ;;  %v1133_v10 = vld [vmem:[#allocation8 + $0x78] sm:$0xff]  ;;  %s3515_s15 = sld [smem:[#allocation28_spill]] (%p1106_p4)  ;;  %vm1632_vm2 = vcmask (%p1106_p4), 31744   ;;  %s1654_s19 = scalar_lea.sflag (%p1106_p4), [#allocation10], %s3079_s28 }
 0x19f   : >> { %2283 = vmatprep.subr.bf16.mxu0 %v2282_v55  ;;  %v2286_v63 = vpack.c.bf16 %v1139_v59, %v1135_v58  ;;  %v1143_v0 = vld [vmem:[#allocation8 + $0xc8] sm:$0xff]  ;;  %v2288_v8 = vpack.c.bf16 %v1138_v62, %v1134_v61  ;;  %v1128_v11 = vld [vmem:[#allocation8 + $0x50] sm:$0xff]  ;;  %v1142_v13 = vld [vmem:[#allocation8 + $0xc0] sm:$0xff]  ;;  %2345 = vmatpush1.bf16.msra.mxu1 %v2344_v7  ;;  %v2346_v15 = vpack.c.bf16 %v1133_v10, %v1129_v9  ;;  %s3516_s29 = sld [smem:[#allocation23_spill]] (%p1106_p4) }
 0x1a0   : >> { %v1147_v3 = vld [vmem:[#allocation8 + $0xe8] sm:$0xff]  ;;  %v1146_v14 = vld [vmem:[#allocation8 + $0xe0] sm:$0xff]  ;;  %v1132_v16 = vld [vmem:[#allocation8 + $0x70] sm:$0xff] }
 0x1a1   : >> { %v2290_v12 = vpack.c.bf16 %v1147_v3, %v1143_v0  ;;  %v1151_v17 = vld [vmem:[#allocation8 + $0x108] sm:$0xff]  ;;  %v2348_v19 = vpack.c.bf16 %v1132_v16, %v1128_v11  ;;  %v1137_v20 = vld [vmem:[#allocation8 + $0x98] sm:$0xff]  ;;  %2347 = vmatprep.subr.bf16.mxu1 %v2346_v15  ;;  %v1136_v22 = vld [vmem:[#allocation8 + $0x90] sm:$0xff]  ;;  %v2292_v24 = vpack.c.bf16 %v1146_v14, %v1142_v13 }
 0x1a2   : >> { %2285 = vmatpush1.bf16.msra.mxu0 %v2284_v60  ;;  %v1155_v18 = vld [vmem:[#allocation8 + $0x128] sm:$0xff]  ;;  %v1141_v21 = vld [vmem:[#allocation8 + $0xb8] sm:$0xff]  ;;  %v1140_v23 = vld [vmem:[#allocation8 + $0xb0] sm:$0xff] }
 0x1a3   : >> { %2287 = vmatprep.subr.bf16.mxu0 %v2286_v63  ;;  %v1150_v25 = vld [vmem:[#allocation8 + $0x100] sm:$0xff]  ;;  %v2350_v29 = vpack.c.bf16 %v1141_v21, %v1137_v20  ;;  %v2294_v30 = vpack.c.bf16 %v1155_v18, %v1151_v17  ;;  %2349 = vmatpush1.bf16.msra.mxu1 %v2348_v19  ;;  %v1159_v31 = vld [vmem:[#allocation8 + $0x148] sm:$0xff]  ;;  %v2352_v32 = vpack.c.bf16 %v1140_v23, %v1136_v22  ;;  %v1145_v33 = vld [vmem:[#allocation8 + $0xd8] sm:$0xff] }
 0x1a4   : >> { %v1154_v28 = vld [vmem:[#allocation8 + $0x120] sm:$0xff]  ;;  %v1149_v34 = vld [vmem:[#allocation8 + $0xf8] sm:$0xff]  ;;  %v1163_v35 = vld [vmem:[#allocation8 + $0x168] sm:$0xff] }
 0x1a5   : >> { %2351 = vmatprep.subr.bf16.mxu1 %v2350_v29  ;;  %v2354_v36 = vpack.c.bf16 %v1149_v34, %v1145_v33  ;;  %v1144_v37 = vld [vmem:[#allocation8 + $0xd0] sm:$0xff]  ;;  %v2296_v39 = vpack.c.bf16 %v1154_v28, %v1150_v25  ;;  %v1153_v42 = vld [vmem:[#allocation8 + $0x118] sm:$0xff]  ;;  %v2298_v45 = vpack.c.bf16 %v1163_v35, %v1159_v31  ;;  %v1158_v40 = vld [vmem:[#allocation8 + $0x140] sm:$0xff]  ;;  %p3517_p6 = scmp.ne.s32.totalorder (%p1106_p4), %s3516_s29, 0 }
 0x1a6   : >> { %2289 = vmatpush1.bf16.msra.mxu0 %v2288_v8  ;;  %v1148_v38 = vld [vmem:[#allocation8 + $0xf0] sm:$0xff]  ;;  %v1157_v44 = vld [vmem:[#allocation8 + $0x138] sm:$0xff]  ;;  %v1162_v41 = vld [vmem:[#allocation8 + $0x160] sm:$0xff] }
 0x1a7   : >> { %2291 = vmatprep.subr.bf16.mxu0 %v2290_v12  ;;  %2353 = vmatpush1.bf16.msra.mxu1 %v2352_v32  ;;  %v1167_v47 = vld [vmem:[#allocation8 + $0x188] sm:$0xff]  ;;  %v2356_v49 = vpack.c.bf16 %v1148_v38, %v1144_v37  ;;  %v2358_v46 = vpack.c.bf16 %v1157_v44, %v1153_v42  ;;  %v1152_v48 = vld [vmem:[#allocation8 + $0x110] sm:$0xff]  ;;  %v1161_v51 = vld [vmem:[#allocation8 + $0x158] sm:$0xff]  ;;  %v2300_v53 = vpack.c.bf16 %v1162_v41, %v1158_v40 }
 0x1a8   : >> { %v1171_v43 = vld [vmem:[#allocation8 + $0x1a8] sm:$0xff]  ;;  %2355 = vmatprep.subr.bf16.mxu1 %v2354_v36  ;;  %v1156_v50 = vld [vmem:[#allocation8 + $0x130] sm:$0xff]  ;;  %v1165_v52 = vld [vmem:[#allocation8 + $0x178] sm:$0xff] }
 0x1a9   : >> { %v2302_v54 = vpack.c.bf16 %v1171_v43, %v1167_v47  ;;  %v1166_v55 = vld [vmem:[#allocation8 + $0x180] sm:$0xff]  ;;  %v1175_v57 = vld [vmem:[#allocation8 + $0x1c8] sm:$0xff]  ;;  %v2360_v58 = vpack.c.bf16 %v1156_v50, %v1152_v48  ;;  %v2362_v60 = vpack.c.bf16 %v1165_v52, %v1161_v51  ;;  %v1160_v61 = vld [vmem:[#allocation8 + $0x150] sm:$0xff] }
 0x1aa   : >> { %2293 = vmatpush1.bf16.msra.mxu0 %v2292_v24  ;;  %v1170_v56 = vld [vmem:[#allocation8 + $0x1a0] sm:$0xff]  ;;  %v1179_v59 = vld [vmem:[#allocation8 + $0x1e8] sm:$0xff]  ;;  %v1164_v62 = vld [vmem:[#allocation8 + $0x170] sm:$0xff] }
 0x1ab   : >> { %2295 = vmatprep.subr.bf16.mxu0 %v2294_v30  ;;  %2357 = vmatpush1.bf16.msra.mxu1 %v2356_v49  ;;  %v1169_v63 = vld [vmem:[#allocation8 + $0x198] sm:$0xff]  ;;  %v2304_v1 = vpack.c.bf16 %v1170_v56, %v1166_v55  ;;  %v2306_v2 = vpack.c.bf16 %v1179_v59, %v1175_v57  ;;  %v1174_v3 = vld [vmem:[#allocation8 + $0x1c0] sm:$0xff]  ;;  %v1183_v5 = vld [vmem:[#allocation8 + $0x208] sm:$0xff]  ;;  %v2364_v6 = vpack.c.bf16 %v1164_v62, %v1160_v61 }
 0x1ac   : >> { %2359 = vmatprep.subr.bf16.mxu1 %v2358_v46  ;;  %v1173_v0 = vld [vmem:[#allocation8 + $0x1b8] sm:$0xff]  ;;  %v1178_v4 = vld [vmem:[#allocation8 + $0x1e0] sm:$0xff]  ;;  %v1187_v7 = vld [vmem:[#allocation8 + $0x228] sm:$0xff] }
 0x1ad   : >> { %v2366_v8 = vpack.c.bf16 %v1173_v0, %v1169_v63  ;;  %v1168_v9 = vld [vmem:[#allocation8 + $0x190] sm:$0xff]  ;;  %v1177_v11 = vld [vmem:[#allocation8 + $0x1d8] sm:$0xff]  ;;  %v2308_v13 = vpack.c.bf16 %v1178_v4, %v1174_v3  ;;  %v2310_v14 = vpack.c.bf16 %v1187_v7, %v1183_v5  ;;  %v1182_v15 = vld [vmem:[#allocation8 + $0x200] sm:$0xff] }
 0x1ae   : >> { %2297 = vmatpush1.bf16.msra.mxu0 %v2296_v39  ;;  %v1172_v10 = vld [vmem:[#allocation8 + $0x1b0] sm:$0xff]  ;;  %v1181_v12 = vld [vmem:[#allocation8 + $0x1f8] sm:$0xff]  ;;  %v1186_v16 = vld [vmem:[#allocation8 + $0x220] sm:$0xff] }
 0x1af   : >> { %2299 = vmatprep.subr.bf16.mxu0 %v2298_v45  ;;  %2361 = vmatpush1.bf16.msra.mxu1 %v2360_v58  ;;  %v1191_v17 = vld [vmem:[#allocation8 + $0x248] sm:$0xff]  ;;  %v2368_v18 = vpack.c.bf16 %v1172_v10, %v1168_v9  ;;  %v2370_v20 = vpack.c.bf16 %v1181_v12, %v1177_v11  ;;  %v1176_v21 = vld [vmem:[#allocation8 + $0x1d0] sm:$0xff]  ;;  %v1185_v23 = vld [vmem:[#allocation8 + $0x218] sm:$0xff]  ;;  %v2312_v25 = vpack.c.bf16 %v1186_v16, %v1182_v15 }
 0x1b0   : >> { %2363 = vmatprep.subr.bf16.mxu1 %v2362_v60  ;;  %v1195_v19 = vld [vmem:[#allocation8 + $0x268] sm:$0xff]  ;;  %v1180_v22 = vld [vmem:[#allocation8 + $0x1f0] sm:$0xff]  ;;  %v1189_v24 = vld [vmem:[#allocation8 + $0x238] sm:$0xff] }
 0x1b1   : >> { %v2314_v28 = vpack.c.bf16 %v1195_v19, %v1191_v17  ;;  %v1190_v29 = vld [vmem:[#allocation8 + $0x240] sm:$0xff]  ;;  %v1199_v31 = vld [vmem:[#allocation8 + $0x288] sm:$0xff]  ;;  %v2372_v32 = vpack.c.bf16 %v1180_v22, %v1176_v21  ;;  %v2374_v34 = vpack.c.bf16 %v1189_v24, %v1185_v23  ;;  %v1184_v35 = vld [vmem:[#allocation8 + $0x210] sm:$0xff] }
 0x1b2   : >> { %2301 = vmatpush1.bf16.msra.mxu0 %v2300_v53  ;;  %v1194_v30 = vld [vmem:[#allocation8 + $0x260] sm:$0xff]  ;;  %v1203_v33 = vld [vmem:[#allocation8 + $0x2a8] sm:$0xff]  ;;  %v1188_v36 = vld [vmem:[#allocation8 + $0x230] sm:$0xff] }
 0x1b3   : >> { %2303 = vmatprep.subr.bf16.mxu0 %v2302_v54  ;;  %2365 = vmatpush1.bf16.msra.mxu1 %v2364_v6  ;;  %v1193_v37 = vld [vmem:[#allocation8 + $0x258] sm:$0xff]  ;;  %v2316_v39 = vpack.c.bf16 %v1194_v30, %v1190_v29  ;;  %v1198_v42 = vld [vmem:[#allocation8 + $0x280] sm:$0xff]  ;;  %v2318_v44 = vpack.c.bf16 %v1203_v33, %v1199_v31  ;;  %v1207_v40 = vld [vmem:[#allocation8 + $0x2c8] sm:$0xff]  ;;  %v2376_v47 = vpack.c.bf16 %v1188_v36, %v1184_v35 }
 0x1b4   : >> { %2367 = vmatprep.subr.bf16.mxu1 %v2366_v8  ;;  %v1197_v38 = vld [vmem:[#allocation8 + $0x278] sm:$0xff]  ;;  %v1202_v45 = vld [vmem:[#allocation8 + $0x2a0] sm:$0xff]  ;;  %v1211_v41 = vld [vmem:[#allocation8 + $0x2e8] sm:$0xff] }
 0x1b5   : >> { %v2378_v49 = vpack.c.bf16 %v1197_v38, %v1193_v37  ;;  %v1192_v43 = vld [vmem:[#allocation8 + $0x250] sm:$0xff]  ;;  %v1117_v48 = vld [vmem:[#allocation4 + $0x8] sm:$0xff]  ;;  %v3246_v52 = vld [vmem:[%s3243_s13] sm:$0xff]  ;;  %v2320_v53 = vpack.c.bf16 %v1202_v45, %v1198_v42  ;;  %v2322_v54 = vpack.c.bf16 %v1211_v41, %v1207_v40 }
 0x1b6   : >> { %2305 = vmatpush1.bf16.msra.mxu0 %v2304_v1  ;;  %v1196_v46 = vld [vmem:[#allocation8 + $0x270] sm:$0xff]  ;;  %v1201_v50 = vld [vmem:[#allocation8 + $0x298] sm:$0xff]  ;;  %1332 = vmatprep.mubr.f32.mxu0 %v1117_v48  ;;  %v1206_v55 = vld [vmem:[#allocation8 + $0x2c0] sm:$0xff] }
 0x1b7   : >> { %2307 = vmatprep.subr.bf16.mxu0 %v2306_v2  ;;  %2369 = vmatpush1.bf16.msra.mxu1 %v2368_v18  ;;  %v1205_v51 = vld [vmem:[#allocation8 + $0x2b8] sm:$0xff]  ;;  %v1210_v56 = vld [vmem:[#allocation8 + $0x2e0] sm:$0xff]  ;;  %v1215_v57 = vld [vmem:[#allocation8 + $0x308] sm:$0xff]  ;;  %v2380_v58 = vpack.c.bf16 %v1196_v46, %v1192_v43 }
 0x1b8   : >> { %2371 = vmatprep.subr.bf16.mxu1 %v2370_v20  ;;  %1403 = vmatprep.mubr.f32.mxu1 %v1117_v48  ;;  %v1219_v59 = vld [vmem:[#allocation8 + $0x328] sm:$0xff]  ;;  %v2382_v60 = vpack.c.bf16 %v1205_v51, %v1201_v50  ;;  %v1200_v61 = vld [vmem:[#allocation8 + $0x290] sm:$0xff]  ;;  %v1209_v63 = vld [vmem:[#allocation8 + $0x2d8] sm:$0xff]  ;;  %v2324_v1 = vpack.c.bf16 %v1210_v56, %v1206_v55  ;;  %v1248_v56 = vlaneseq }
 0x1b9   : >> { %v1204_v62 = vld [vmem:[#allocation8 + $0x2b0] sm:$0xff]  ;;  %v1213_v0 = vld [vmem:[#allocation8 + $0x2f8] sm:$0xff]  ;;  %v2326_v2 = vpack.c.bf16 %v1219_v59, %v1215_v57  ;;  %v1214_v3 = vld [vmem:[#allocation8 + $0x300] sm:$0xff] }
 0x1ba   : >> { %2309 = vmatpush1.bf16.msra.mxu0 %v2308_v13  ;;  %v1218_v4 = vld [vmem:[#allocation8 + $0x320] sm:$0xff]  ;;  %v1223_v5 = vld [vmem:[#allocation8 + $0x348] sm:$0xff]  ;;  %v2384_v6 = vpack.c.bf16 %v1204_v62, %v1200_v61  ;;  %v2386_v8 = vpack.c.bf16 %v1213_v0, %v1209_v63  ;;  %v1208_v9 = vld [vmem:[#allocation8 + $0x2d0] sm:$0xff]  ;;  %v1249_v57 = vshrl.u32 %v1248_v56, 7 }
 0x1bb   : >> { %2311 = vmatprep.subr.bf16.mxu0 %v2310_v14  ;;  %2373 = vmatpush1.bf16.msra.mxu1 %v2372_v32  ;;  %v1227_v7 = vld [vmem:[#allocation8 + $0x368] sm:$0xff]  ;;  %v1212_v10 = vld [vmem:[#allocation8 + $0x2f0] sm:$0xff]  ;;  %v1217_v11 = vld [vmem:[#allocation8 + $0x318] sm:$0xff]  ;;  %v2328_v13 = vpack.c.bf16 %v1218_v4, %v1214_v3 }
 0x1bc   : >> { %2375 = vmatprep.subr.bf16.mxu1 %v2374_v34  ;;  %v1221_v12 = vld [vmem:[#allocation8 + $0x338] sm:$0xff]  ;;  %v2330_v14 = vpack.c.bf16 %v1227_v7, %v1223_v5  ;;  %v1222_v15 = vld [vmem:[#allocation8 + $0x340] sm:$0xff]  ;;  %v1231_v17 = vld [vmem:[#allocation8 + $0x388] sm:$0xff]  ;;  %v2388_v18 = vpack.c.bf16 %v1212_v10, %v1208_v9  ;;  %v1262_v63 = vsub.s32 3, %v1249_v57 }
 0x1bd   : >> { %v1226_v16 = vld [vmem:[#allocation8 + $0x360] sm:$0xff]  ;;  %v1235_v19 = vld [vmem:[#allocation8 + $0x3a8] sm:$0xff]  ;;  %v2390_v20 = vpack.c.bf16 %v1221_v12, %v1217_v11  ;;  %v1216_v21 = vld [vmem:[#allocation8 + $0x310] sm:$0xff] }
 0x1be   : >> { %2313 = vmatpush1.bf16.msra.mxu0 %v2312_v25  ;;  %v1220_v22 = vld [vmem:[#allocation8 + $0x330] sm:$0xff]  ;;  %v1225_v23 = vld [vmem:[#allocation8 + $0x358] sm:$0xff]  ;;  %v2332_v25 = vpack.c.bf16 %v1226_v16, %v1222_v15  ;;  %v1230_v29 = vld [vmem:[#allocation8 + $0x380] sm:$0xff] }
 0x1bf   : >> { %2315 = vmatprep.subr.bf16.mxu0 %v2314_v28  ;;  %2377 = vmatpush1.bf16.msra.mxu1 %v2376_v47  ;;  %v1229_v24 = vld [vmem:[#allocation8 + $0x378] sm:$0xff]  ;;  %v2334_v28 = vpack.c.bf16 %v1235_v19, %v1231_v17  ;;  %v1234_v30 = vld [vmem:[#allocation8 + $0x3a0] sm:$0xff]  ;;  %v1239_v31 = vld [vmem:[#allocation8 + $0x3c8] sm:$0xff]  ;;  %v2392_v32 = vpack.c.bf16 %v1220_v22, %v1216_v21 }
 0x1c0   : >> { %2379 = vmatprep.subr.bf16.mxu1 %v2378_v49  ;;  %v1243_v33 = vld [vmem:[#allocation8 + $0x3e8] sm:$0xff]  ;;  %v2394_v34 = vpack.c.bf16 %v1229_v24, %v1225_v23  ;;  %v1224_v35 = vld [vmem:[#allocation8 + $0x350] sm:$0xff]  ;;  %v1233_v37 = vld [vmem:[#allocation8 + $0x398] sm:$0xff] }
 0x1c1   : >> { %v1228_v36 = vld [vmem:[#allocation8 + $0x370] sm:$0xff]  ;;  %v1237_v38 = vld [vmem:[#allocation8 + $0x3b8] sm:$0xff]  ;;  %v2338_v42 = vpack.c.bf16 %v1243_v33, %v1239_v31  ;;  %v1242_v45 = vld [vmem:[#allocation8 + $0x3e0] sm:$0xff] }
 0x1c2   : >> { %2317 = vmatpush1.bf16.msra.mxu0 %v2316_v39  ;;  %v2336_v39 = vpack.c.bf16 %v1234_v30, %v1230_v29  ;;  %v2396_v40 = vpack.c.bf16 %v1228_v36, %v1224_v35  ;;  %v2398_v41 = vpack.c.bf16 %v1237_v38, %v1233_v37  ;;  %v1232_v47 = vld [vmem:[#allocation8 + $0x390] sm:$0xff]  ;;  %v1241_v43 = vld [vmem:[#allocation8 + $0x3d8] sm:$0xff]  ;;  %v1246_v59 = vld [vmem:[%s3464_s6] sm:$0xf] }
 0x1c3   : >> { %2319 = vmatprep.subr.bf16.mxu0 %v2318_v44  ;;  %2381 = vmatpush1.bf16.msra.mxu1 %v2380_v58  ;;  %v1238_v44 = vld [vmem:[#allocation8 + $0x3c0] sm:$0xff]  ;;  %v1236_v49 = vld [vmem:[#allocation8 + $0x3b0] sm:$0xff]  ;;  %v1245_v46 = vld [vmem:[#allocation8 + $0x3f8] sm:$0xff]  ;;  %v1250_v58 = vsub.s32 0, %v1249_v57  ;;  %v1263_v5 = vrot.slane %v1246_v59, %v1262_v63 }
 0x1c4   : >> { %2383 = vmatprep.subr.bf16.mxu1 %v2382_v60  ;;  %v2340_v48 = vpack.c.bf16 %v1242_v45, %v1238_v44  ;;  %v2400_v50 = vpack.c.bf16 %v1236_v49, %v1232_v47  ;;  %v2402_v51 = vpack.c.bf16 %v1245_v46, %v1241_v43  ;;  %v1254_v60 = vsub.s32 1, %v1249_v57  ;;  %v1465_v33 = vld [vmem:[%s3465_s7 + $0x8] sm:$0xff] (%p1106_p4)  ;;  %v1468_v37 = vld [vmem:[%s3465_s7 + $0x20] sm:$0xff] (%p1106_p4)  ;;  %v1470_v45 = vld [vmem:[%s3465_s7 + $0x30] sm:$0xff] (%p1106_p4) }
 0x1c5   : >> { %v1251_v61 = vrot.slane %v1246_v59, %v1250_v58  ;;  %v1469_v38 = vld [vmem:[%s3465_s7 + $0x28] sm:$0xff] (%p1106_p4)  ;;  %v1472_v47 = vld [vmem:[%s3465_s7 + $0x40] sm:$0xff] (%p1106_p4)  ;;  %v1474_v46 = vld [vmem:[%s3465_s7 + $0x50] sm:$0xff] (%p1106_p4) }
 0x1c6   : >> { %2321 = vmatpush1.bf16.msra.mxu0 %v2320_v53  ;;  %v1240_v53 = vld [vmem:[#allocation8 + $0x3d0] sm:$0xff]  ;;  %v1255_v62 = vrot.slane %v1246_v59, %v1254_v60  ;;  %v1473_v49 = vld [vmem:[%s3465_s7 + $0x48] sm:$0xff] (%p1106_p4)  ;;  %v1479_v56 = vld [vmem:[%s3465_s7 + $0x78] sm:$0xff] (%p1106_p4) }
 0x1c7   : >> { %2323 = vmatprep.subr.bf16.mxu0 %v2322_v54  ;;  %2385 = vmatpush1.bf16.msra.mxu1 %v2384_v6  ;;  %v1244_v54 = vld [vmem:[#allocation8 + $0x3f0] sm:$0xff]  ;;  %v2422_v43 = vpack.c.bf16 (%p1106_p4), %v1473_v49, %v1472_v47 }
 0x1c8   : >> { %2387 = vmatprep.subr.bf16.mxu1 %v2386_v8  ;;  %v2404_v55 = vpack.c.bf16 %v1244_v54, %v1240_v53  ;;  %v1477_v53 = vld [vmem:[%s3465_s7 + $0x68] sm:$0xff] (%p1106_p4) }
 0x1ca   : >> { %2325 = vmatpush1.bf16.msra.mxu0 %v2324_v1 }
 0x1cb   : >> { %2327 = vmatprep.subr.bf16.mxu0 %v2326_v2  ;;  %2389 = vmatpush1.bf16.msra.mxu1 %v2388_v18 }
 0x1cc   : >> { %2391 = vmatprep.subr.bf16.mxu1 %v2390_v20  ;;  %v1438_v20 = vstv %s1437_s14 }
 0x1cd   : >> { %vm1439_vm1 = vcmp.eq.s32.totalorder %v1438_v20, 1 }
 0x1ce   : >> { %2329 = vmatpush1.bf16.msra.mxu0 %v2328_v13 }
 0x1cf   : >> { %2331 = vmatprep.subr.bf16.mxu0 %v2330_v14  ;;  %2393 = vmatpush1.bf16.msra.mxu1 %v2392_v32 }
 0x1d0   : >> { %2395 = vmatprep.subr.bf16.mxu1 %v2394_v34  ;;  %v1466_v34 = vld [vmem:[%s3465_s7 + $0x10] sm:$0xff] (%p1106_p4) }
 0x1d2   : >> { %2333 = vmatpush1.bf16.msra.mxu0 %v2332_v25 }
 0x1d3   : >> { %2335 = vmatprep.subr.bf16.mxu0 %v2334_v28  ;;  %2397 = vmatpush1.bf16.msra.mxu1 %v2396_v40  ;;  %v1471_v40 = vld [vmem:[%s3465_s7 + $0x38] sm:$0xff] (%p1106_p4) }
 0x1d4   : >> { %2399 = vmatprep.subr.bf16.mxu1 %v2398_v41  ;;  %v2418_v41 = vpack.c.bf16 (%p1106_p4), %v1471_v40, %v1470_v45 }
 0x1d6   : >> { %2337 = vmatpush1.bf16.msra.mxu0 %v2336_v39  ;;  %v2414_v39 = vpack.c.bf16 (%p1106_p4), %v1469_v38, %v1468_v37 }
 0x1d7   : >> { %2339 = vmatprep.subr.bf16.mxu0 %v2338_v42  ;;  %2401 = vmatpush1.bf16.msra.mxu1 %v2400_v50 }
 0x1d8   : >> { %2403 = vmatprep.subr.bf16.mxu1 %v2402_v51  ;;  %v1476_v51 = vld [vmem:[%s3465_s7 + $0x60] sm:$0xff] (%p1106_p4) }
 0x1d9   : > { %v2430_v54 = vpack.c.bf16 (%p1106_p4), %v1477_v53, %v1476_v51 }
 0x1da   : >> { %2341 = vmatpush1.bf16.msra.mxu0 %v2340_v48  ;;  %v1475_v48 = vld [vmem:[%s3465_s7 + $0x58] sm:$0xff] (%p1106_p4) }
 0x1db   : >> { %2405 = vmatpush1.bf16.msra.mxu1 %v2404_v55  ;;  %v2426_v50 = vpack.c.bf16 (%p1106_p4), %v1475_v48, %v1474_v46  ;;  %v1478_v55 = vld [vmem:[%s3465_s7 + $0x70] sm:$0xff] (%p1106_p4) }
 0x1dd   : >> { %1333 = vmatmul.mubr.f32.vlgmr.msra.gmra.mrb[0].mxu0 %v3246_v52 }
 0x1de   : >> { %1404 = vmatmul.mubr.f32.vlgmr.msra.gmra.mrb[0].mxu1 %v3246_v52  ;;  %v1258_v52 = vsub.s32 2, %v1249_v57  ;;  %v2434_v57 = vpack.c.bf16 (%p1106_p4), %v1479_v56, %v1478_v55 }
 0x1e0   : >> { %v1259_v10 = vrot.slane %v1246_v59, %v1258_v52 }
 0x2b0   : >> { %v1334_v0 = vpop.f32.mrb[0].mxu0 }
 0x2b1   : >> { %v1335_v1 = vadd.f32 %v1334_v0, %v1251_v61  ;;  %v1336_v2 = vpop.f32.mrb[1].mxu0  ;;  %v1405_v7 = vpop.f32.mrb[0].mxu1 }
 0x2b2   : >> { %v1337_v3 = vadd.f32 %v1336_v2, %v1255_v62  ;;  %v1407_v8 = vpop.f32.mrb[1].mxu1  ;;  %v1406_v12 = vadd.f32 %v1405_v7, %v1259_v10  ;;  %v2013_v7 = vld [vmem:[%s3515_s15] ss:$0 sm:$0xff] (%p1106_p4) }
 0x2b3   : >> { %v2009_v4 = vmul.f32 -1.442695, %v1335_v1  ;;  %v1408_v9 = vadd.f32 %v1407_v8, %v1263_v5 }
 0x2b4   : >> { %v2010_v6 = vmul.f32 -1.442695, %v1337_v3 }
 0x2b5   : >> { %2600 = vpow2.f32 %v2009_v4  ;;  %v2011_v11 = vmul.f32 -1.442695, %v1408_v9 }
 0x2b6   : >> { %2602 = vpow2.f32 %v2010_v6 }
 0x2b7   : >> { %2604 = vpow2.f32 %v2011_v11 }
 0x2b8   : >> { %2606 = vtanh.f32 %v1406_v12 }
 0x2bf   : >> { %v2601_v13 = vpop.eup %2600 }
 0x2c0   : >> { %v2603_v14 = vpop.eup %2602  ;;  %v1413_v15 = vadd.f32 1.0, %v2601_v13 }
 0x2c1   : >> { %v1419_v16 = vadd.f32 1.0, %v2603_v14  ;;  %v2605_v17 = vpop.eup %2604 }
 0x2c2   : >> { %2608 = vrcp.f32 %v1413_v15  ;;  %v2607_v18 = vpop.eup %2606  ;;  %v1426_v21 = vadd.f32 1.0, %v2605_v17 }
 0x2c3   : >> { %2610 = vrcp.f32 %v1419_v16 }
 0x2c4   : >> { %2612 = vrcp.f32 %v1426_v21 }
 0x2cc   : >> { %v2609_v19 = vpop.eup %2608 }
 0x2cd   : >> { %v2611_v22 = vpop.eup %2610  ;;  %v1430_v23 = vmul.f32 %v2609_v19, %v2607_v18 }
 0x2ce   : >> { %v1429_v24 = vmul.f32 %v2806_v27, %v2611_v22  ;;  %v2613_v29 = vpop.eup %2612 }
 0x2d0   : >> { %v1431_v25 = vadd.f32 %v1430_v23, %v1429_v24 }
 0x2d2   : >> { %2614 = vtanh.f32 %v1431_v25  ;;  %v1440_v28 = vsel %vm1439_vm1, %v1431_v25, %v2806_v27  }
 0x2d3   : >> { %v3513_v27 = vmov %v1440_v28  ;;  %1445 = vst [vmem:[#allocation3] sm:$0xff] (%p1106_p4), %v1440_v28  ;;  %1447 = vst [vmem:[%s3086_s20] sm:$0xff] (%p1106_p4), %v1440_v28 }
 0x2d4   : > { %v1467_v27 = vld [vmem:[%s3465_s7 + $0x18] sm:$0xff] (%p1106_p4) }
 0x2d5   : > { %v2410_v36 = vpack.c.bf16 (%p1106_p4), %v1467_v27, %v1466_v34 }
 0x2da   : > { %1108 = sbr.rel (!%p1106_p4) target bundleno = 409 (0x199), region = 264 }
 0x2dc   : >> { %v2615_v30 = vpop.eup %2614 }
 0x2dd   : >> { %v1433_v31 = vmul.f32 %v2615_v30, %v2613_v29 }
 0x2df   : >> { %v1441_v32 = vsel %vm1439_vm1, %v1433_v31, %v2810_v26  }
 0x2e0   : >> { %1442 = vst [vmem:[#allocation4 + $0x8] sm:$0xff] %v1441_v32  ;;  %1443 = vst [vmem:[%s3243_s13] sm:$0xff] %v1441_v32  ;;  %v3514_v26 = vmov %v1441_v32 }
 0x2e1   : > { %1444 = vst [vmem:[#allocation2] sm:$0xff] %v1441_v32  ;;  %1446 = vst [vmem:[%s3084_s23] sm:$0xff] %v1441_v32  ;;  %v1464_v26 = vld [vmem:[%s3465_s7] sm:$0xff]  ;;  %s3518_s14 = sld [smem:[#allocation20_spill]] (%p3517_p6)  ;;  %s2026_s16 = sshll.u32 (%p3517_p6), %s2786_s22, 5 }
 0x2e2   : > { %v2406_v35 = vpack.c.bf16 %v1465_v33, %v1464_v26  ;;  %s3519_s30 = sld [smem:[#allocation29_spill]] (%p3517_p6) }
 0x2e4   : > { %2407 = vmatprep.subr.bf16.mxu0 %v2406_v35  ;;  %2454 = vmatprep.subr.bf16.mxu1 %v2406_v35 }
 0x2e5   : > { %2409 = vmatpush3.bf16.msra.mxu0 %v2406_v35  ;;  %2462 = vmatpush3.bf16.msra.mxu1 %v2406_v35 }
 0x2e6   : > { %2411 = vmatprep.subr.bf16.mxu0 %v2410_v36  ;;  %2455 = vmatprep.subr.bf16.mxu1 %v2410_v36 }
 0x2e7   : > { %v1448_v42 = vld [vmem:[#allocation5] sm:$0xff]  ;;  %v1449_v58 = vld [vmem:[#allocation5 + $0x8] sm:$0xff]  ;;  %v1450_v60 = vld [vmem:[#allocation5 + $0x10] sm:$0xff]  ;;  %s1668_s17 = sadd.s32 (%p3517_p6), %s3518_s14, %s2026_s16 }
 0x2e8   : > { %v1456_v44 = vld [vmem:[#allocation5 + $0x40] sm:$0xff]  ;;  %2222 = vmatprep.mubr.f32.mxu0 %v1448_v42  ;;  %v1457_v59 = vld [vmem:[#allocation5 + $0x48] sm:$0xff]  ;;  %v1458_v61 = vld [vmem:[#allocation5 + $0x50] sm:$0xff]  ;;  %s2019_s8 = sshll.u32 (%p3517_p6), %s1668_s17, 3 }
 0x2e9   : > { %2234 = vmatprep.mubr.f32.mxu1 %v1456_v44  ;;  %2413 = vmatpush3.bf16.msra.mxu0 %v2410_v36  ;;  %v1451_v62 = vld [vmem:[#allocation5 + $0x18] sm:$0xff]  ;;  %v1452_v0 = vld [vmem:[#allocation5 + $0x20] sm:$0xff]  ;;  %v1453_v2 = vld [vmem:[#allocation5 + $0x28] sm:$0xff]  ;;  %s1670_s9 = scalar_lea.vmem (%p3517_p6), %s3519_s30, %s2019_s8 }
 0x2ea   : > { %2463 = vmatpush3.bf16.msra.mxu1 %v2410_v36  ;;  %2415 = vmatprep.subr.bf16.mxu0 %v2414_v39  ;;  %v1459_v63 = vld [vmem:[#allocation5 + $0x58] sm:$0xff]  ;;  %v1460_v1 = vld [vmem:[#allocation5 + $0x60] sm:$0xff]  ;;  %v1461_v3 = vld [vmem:[#allocation5 + $0x68] sm:$0xff] }
 0x2eb   : > { %2456 = vmatprep.subr.bf16.mxu1 %v2414_v39  ;;  %v1454_v4 = vld [vmem:[#allocation5 + $0x30] sm:$0xff]  ;;  %v1455_v6 = vld [vmem:[#allocation5 + $0x38] sm:$0xff] }
 0x2ec   : > { %v1462_v5 = vld [vmem:[#allocation5 + $0x70] sm:$0xff]  ;;  %v1463_v52 = vld [vmem:[#allocation5 + $0x78] sm:$0xff] }
 0x2ed   : > { %2417 = vmatpush3.bf16.msra.mxu0 %v2414_v39 }
 0x2ee   : > { %2464 = vmatpush3.bf16.msra.mxu1 %v2414_v39  ;;  %2419 = vmatprep.subr.bf16.mxu0 %v2418_v41 }
 0x2ef   : > { %2457 = vmatprep.subr.bf16.mxu1 %v2418_v41 }
 0x2f1   : > { %2421 = vmatpush3.bf16.msra.mxu0 %v2418_v41 }
 0x2f2   : > { %2465 = vmatpush3.bf16.msra.mxu1 %v2418_v41  ;;  %2423 = vmatprep.subr.bf16.mxu0 %v2422_v43 }
 0x2f3   : > { %2458 = vmatprep.subr.bf16.mxu1 %v2422_v43 }
 0x2f5   : > { %2425 = vmatpush3.bf16.msra.mxu0 %v2422_v43 }
 0x2f6   : > { %2466 = vmatpush3.bf16.msra.mxu1 %v2422_v43  ;;  %2427 = vmatprep.subr.bf16.mxu0 %v2426_v50 }
 0x2f7   : > { %2459 = vmatprep.subr.bf16.mxu1 %v2426_v50 }
 0x2f9   : > { %2429 = vmatpush3.bf16.msra.mxu0 %v2426_v50 }
 0x2fa   : > { %2467 = vmatpush3.bf16.msra.mxu1 %v2426_v50  ;;  %2431 = vmatprep.subr.bf16.mxu0 %v2430_v54 }
 0x2fb   : > { %2460 = vmatprep.subr.bf16.mxu1 %v2430_v54 }
 0x2fd   : > { %2433 = vmatpush3.bf16.msra.mxu0 %v2430_v54 }
 0x2fe   : > { %2468 = vmatpush3.bf16.msra.mxu1 %v2430_v54  ;;  %2435 = vmatprep.subr.bf16.mxu0 %v2434_v57 }
 0x2ff   : > { %2461 = vmatprep.subr.bf16.mxu1 %v2434_v57 }
 0x301   : > { %2437 = vmatpush3.bf16.msra.mxu0 %v2434_v57 }
 0x302   : > { %2469 = vmatpush3.bf16.msra.mxu1 %v2434_v57 }
 0x304   : > { %2223 = vmatmul.mubr.f32.vlgmr.msra.gmra.mrb[0].mxu0 %v1449_v58 }
 0x305   : > { %2235 = vmatmul.mubr.f32.vlgmr.msra.gmra.mrb[0].mxu1 %v1457_v59  ;;  %2225 = vmatprep.mubr.f32.mxu0 %v1450_v60 }
 0x306   : > { %2237 = vmatprep.mubr.f32.mxu1 %v1458_v61 }
 0x308   : > { %2226 = vmatmul.mubr.f32.gmra.mrb[2].mxu0 %v1451_v62 }
 0x309   : > { %2238 = vmatmul.mubr.f32.gmra.mrb[2].mxu1 %v1459_v63  ;;  %2228 = vmatprep.mubr.f32.mxu0 %v1452_v0 }
 0x30a   : > { %2240 = vmatprep.mubr.f32.mxu1 %v1460_v1 }
 0x30c   : > { %2229 = vmatmul.mubr.f32.gmra.mrb[4].mxu0 %v1453_v2 }
 0x30d   : > { %2241 = vmatmul.mubr.f32.gmra.mrb[4].mxu1 %v1461_v3  ;;  %2231 = vmatprep.mubr.f32.mxu0 %v1454_v4 }
 0x30e   : > { %2243 = vmatprep.mubr.f32.mxu1 %v1462_v5 }
 0x310   : > { %2232 = vmatmul.mubr.f32.gmra.mrb[6].mxu0 %v1455_v6 }
 0x311   : > { %2244 = vmatmul.mubr.f32.gmra.mrb[6].mxu1 %v1463_v52 }
 0x3d7   : > { %v2224_v8 = vpop.f32.mrb[0].mxu0 }
 0x3d8   : > { %v2236_v9 = vpop.f32.mrb[0].mxu1  ;;  %v1559_v10 = vadd.f32 %v2224_v8, %v2013_v7  ;;  %v1553_v12 = vpop.f32.mrb[1].mxu0 }
 0x3d9   : > { %v1599_v11 = vadd.f32 %v2236_v9, %v2013_v7  ;;  %v1593_v13 = vpop.f32.mrb[1].mxu1  ;;  %v1554_v14 = vadd.f32 %v2013_v7, %v1553_v12 }
 0x3da   : > { %v1594_v15 = vadd.f32 %v2013_v7, %v1593_v13  ;;  %1634 = vst.msk [vmem:[%s3082_s11 + $0x8] sm:$0xff] %vm1632_vm2, %v1559_v10 }
 0x3db   : > { %1642 = vst.msk [vmem:[%s3082_s11 + $0x48] sm:$0xff] %vm1632_vm2, %v1599_v11  ;;  %1633 = vst.msk [vmem:[%s3082_s11] sm:$0xff] %vm1632_vm2, %v1554_v14  ;;  %v2227_v16 = vpop.f32.mrb[2].mxu0 }
 0x3dc   : > { %1641 = vst.msk [vmem:[%s3082_s11 + $0x40] sm:$0xff] %vm1632_vm2, %v1594_v15  ;;  %v2239_v17 = vpop.f32.mrb[2].mxu1  ;;  %v1569_v18 = vadd.f32 %v2227_v16, %v2013_v7  ;;  %v1563_v20 = vpop.f32.mrb[3].mxu0 }
 0x3dd   : > { %v1609_v19 = vadd.f32 %v2239_v17, %v2013_v7  ;;  %v1603_v21 = vpop.f32.mrb[3].mxu1  ;;  %v1564_v22 = vadd.f32 %v2013_v7, %v1563_v20 }
 0x3de   : > { %v1604_v23 = vadd.f32 %v2013_v7, %v1603_v21  ;;  %1636 = vst.msk [vmem:[%s3082_s11 + $0x18] sm:$0xff] %vm1632_vm2, %v1569_v18 }
 0x3df   : > { %1644 = vst.msk [vmem:[%s3082_s11 + $0x58] sm:$0xff] %vm1632_vm2, %v1609_v19  ;;  %1635 = vst.msk [vmem:[%s3082_s11 + $0x10] sm:$0xff] %vm1632_vm2, %v1564_v22  ;;  %v2230_v24 = vpop.f32.mrb[4].mxu0 }
 0x3e0   : > { %1643 = vst.msk [vmem:[%s3082_s11 + $0x50] sm:$0xff] %vm1632_vm2, %v1604_v23  ;;  %v2242_v25 = vpop.f32.mrb[4].mxu1  ;;  %v1579_v28 = vadd.f32 %v2230_v24, %v2013_v7  ;;  %v1573_v30 = vpop.f32.mrb[5].mxu0 }
 0x3e1   : > { %v1619_v29 = vadd.f32 %v2242_v25, %v2013_v7  ;;  %v1613_v31 = vpop.f32.mrb[5].mxu1  ;;  %v1574_v32 = vadd.f32 %v2013_v7, %v1573_v30  ;;  %v1730_v44 = vld [vmem:[%s3082_s11 + $0x8] sm:$0xff] (%p3517_p6) }
 0x3e2   : > { %v1614_v26 = vadd.f32 %v2013_v7, %v1613_v31  ;;  %1638 = vst.msk [vmem:[%s3082_s11 + $0x28] sm:$0xff] %vm1632_vm2, %v1579_v28  ;;  %1665 = sbr.rel (!%p3517_p6) target bundleno = 1009 (0x3f1), region = 151  ;;  %v1728_v42 = vld [vmem:[%s3082_s11] sm:$0xff] (%p3517_p6)  ;;  %v1746_v48 = vld [vmem:[%s3082_s11 + $0x48] sm:$0xff] (%p3517_p6)  ;;  %1731 = vst [vmem:[%s1670_s9 + $0x10] sm:$0xff] (%p3517_p6), %v1730_v44 }
 0x3e3   : > { %1646 = vst.msk [vmem:[%s3082_s11 + $0x68] sm:$0xff] %vm1632_vm2, %v1619_v29  ;;  %1637 = vst.msk [vmem:[%s3082_s11 + $0x20] sm:$0xff] %vm1632_vm2, %v1574_v32  ;;  %v2233_v33 = vpop.f32.mrb[6].mxu0  ;;  %v1744_v46 = vld [vmem:[%s3082_s11 + $0x40] sm:$0xff] (%p3517_p6) }
 0x3e4   : > { %1645 = vst.msk [vmem:[%s3082_s11 + $0x60] sm:$0xff] %vm1632_vm2, %v1614_v26  ;;  %v2245_v34 = vpop.f32.mrb[6].mxu1  ;;  %v1589_v35 = vadd.f32 %v2233_v33, %v2013_v7  ;;  %v1583_v36 = vpop.f32.mrb[7].mxu0  ;;  %1729 = vst [vmem:[%s1670_s9] sm:$0xff] (%p3517_p6), %v1728_v42 }
 0x3e5   : > { %v1629_v27 = vadd.f32 %v2245_v34, %v2013_v7  ;;  %v1623_v37 = vpop.f32.mrb[7].mxu1  ;;  %v1584_v38 = vadd.f32 %v2013_v7, %v1583_v36  ;;  %v1734_v40 = vld [vmem:[%s3082_s11 + $0x18] sm:$0xff] (%p3517_p6)  ;;  %1745 = vst [vmem:[%s1670_s9 + $0x80] sm:$0xff] (%p3517_p6), %v1744_v46  ;;  %1747 = vst [vmem:[%s1670_s9 + $0x90] sm:$0xff] (%p3517_p6), %v1746_v48 }
 0x3e6   : > { %v1624_v39 = vadd.f32 %v2013_v7, %v1623_v37  ;;  %1640 = vst.msk [vmem:[%s3082_s11 + $0x38] sm:$0xff] %vm1632_vm2, %v1589_v35  ;;  %v1732_v45 = vld [vmem:[%s3082_s11 + $0x10] sm:$0xff] (%p3517_p6)  ;;  %v1750_v51 = vld [vmem:[%s3082_s11 + $0x58] sm:$0xff] (%p3517_p6)  ;;  %1735 = vst [vmem:[%s1670_s9 + $0x30] sm:$0xff] (%p3517_p6), %v1734_v40 }
 0x3e7   : > { %1648 = vst.msk [vmem:[%s3082_s11 + $0x78] sm:$0xff] %vm1632_vm2, %v1629_v27  ;;  %1639 = vst.msk [vmem:[%s3082_s11 + $0x30] sm:$0xff] %vm1632_vm2, %v1584_v38  ;;  %v1748_v50 = vld [vmem:[%s3082_s11 + $0x50] sm:$0xff] (%p3517_p6) }
 0x3e8   : > { %1647 = vst.msk [vmem:[%s3082_s11 + $0x70] sm:$0xff] %vm1632_vm2, %v1624_v39  ;;  %1733 = vst [vmem:[%s1670_s9 + $0x20] sm:$0xff] (%p3517_p6), %v1732_v45 }
 0x3e9   : > { %v1738_v47 = vld [vmem:[%s3082_s11 + $0x28] sm:$0xff]  ;;  %1749 = vst [vmem:[%s1670_s9 + $0xa0] sm:$0xff] %v1748_v50  ;;  %1751 = vst [vmem:[%s1670_s9 + $0xb0] sm:$0xff] %v1750_v51 }
 0x3ea   : > { %v1736_v41 = vld [vmem:[%s3082_s11 + $0x20] sm:$0xff]  ;;  %1739 = vst [vmem:[%s1670_s9 + $0x50] sm:$0xff] %v1738_v47  ;;  %v1754_v54 = vld [vmem:[%s3082_s11 + $0x68] sm:$0xff] }
 0x3eb   : > { %1737 = vst [vmem:[%s1670_s9 + $0x40] sm:$0xff] %v1736_v41  ;;  %v1752_v53 = vld [vmem:[%s3082_s11 + $0x60] sm:$0xff]  ;;  %1755 = vst [vmem:[%s1670_s9 + $0xd0] sm:$0xff] %v1754_v54 }
 0x3ec   : > { %1753 = vst [vmem:[%s1670_s9 + $0xc0] sm:$0xff] %v1752_v53 }
 0x3ed   : > { %v1742_v43 = vld [vmem:[%s3082_s11 + $0x38] sm:$0xff] }
 0x3ee   : > { %v1740_v49 = vld [vmem:[%s3082_s11 + $0x30] sm:$0xff]  ;;  %1743 = vst [vmem:[%s1670_s9 + $0x70] sm:$0xff] %v1742_v43  ;;  %v1758_v56 = vld [vmem:[%s3082_s11 + $0x78] sm:$0xff] }
 0x3ef   : > { %1741 = vst [vmem:[%s1670_s9 + $0x60] sm:$0xff] %v1740_v49  ;;  %v1756_v55 = vld [vmem:[%s3082_s11 + $0x70] sm:$0xff]  ;;  %1759 = vst [vmem:[%s1670_s9 + $0xf0] sm:$0xff] %v1758_v56 }
 0x3f0   : > { %1757 = vst [vmem:[%s1670_s9 + $0xe0] sm:$0xff] %v1756_v55 }
 0x3f1 PF: > { %s3520_s22 = sld [smem:[#allocation20_spill]]  ;;  %s3521_s13 = sld [smem:[#allocation24_spill]] }
 0x3f2   : > { %s1772_s29 = sshll.u32 %s3084_s23, 4  ;;  %s3522_s17 = sld [smem:[#allocation30_spill]]  ;;  %s1773_s29 = int_to_ptr.vmem [resolvable:$true] %s1772_s29 }
 0x3f3   : > { %s2644_s12 = scalar_lea.vmem %s1773_s29, 128  ;;  %s2820_s11 = smov [#allocation12]  }
 0x3f4   : > { %p2645_p10 = scmp.ne.s32.totalorder %s1773_s29, %s2644_s12  ;;  %s2648_s30 = sshll.u32 %s2820_s11, 4  ;;  %s2649_s30 = int_to_ptr.vmem [resolvable:$false] %s2648_s30 }
 0x3f5   : > { %s2650_s9 = scalar_lea.vmem %s2649_s30, 256  ;;  %p2651_p5 = scmp.lt.s32.totalorder %s1773_s29, %s2649_s30 }
 0x3f6   : > { %p2652_p9 = scmp.lt.s32.totalorder %s2650_s9, %s2644_s12 }
 0x3f7   : > { %s3486_s15 = sshll.u32 %s3520_s22, 7  ;;  %p3524_p12 = scmp.ne.s32.totalorder %s3521_s13, 0 }
 0x3f8   : > { %s3523_s8 = smov %s3522_s17  ;;  %s1770_s10 = scalar_lea.hbm %s3522_s17, %s3486_s15 }
 0x3f9   : > { %p2646_p0 = pnand %p2645_p10, %p3524_p12  ;;  %p2653_p11 = por %p2652_p9, %p2651_p5 }
 0x3fb   : > { %p2647_p1 = pneg %p2646_p0 }
 0x3fd   : > { %p2654_p3 = pnand %p2653_p11, %p2647_p1 }
 0x3ff   : > { %2657 = shalt.err (!%p2654_p3)
}
 0x400   : > { %s2658_s23 = scalar_lea.hbm %s1770_s10, 128  ;;  %s2662_s17 = scalar_lea.hbm %s3523_s8, 256 }
 0x401   : > { %p2659_p7 = scmp.ne.s32.totalorder %s1770_s10, %s2658_s23  ;;  %p2663_p2 = scmp.lt.u32.totalorder %s1770_s10, %s3523_s8 }
 0x402   : > { %p2664_p4 = scmp.lt.u32.totalorder %s2662_s17, %s2658_s23  ;;  %p2666_p10 = scmp.lt.u32.totalorder %s2658_s23, %s1770_s10 }
 0x403   : > { %p2660_p8 = pnand %p2659_p7, %p3524_p12 }
 0x404   : > { %p2665_p6 = por %p2664_p4, %p2663_p2 }
 0x405   : > { %p2661_p13 = pneg %p2660_p8 }
 0x406   : > { %p2667_p0 = por %p2666_p10, %p2665_p6 }
 0x408   : > { %p2668_p1 = pnand %p2667_p0, %p2661_p13 }
 0x40a   : > { %2671 = shalt.err (!%p2668_p1)
}
 0x40b   : > { %2474 = dma.vmem_to_hbm [thread:$0]  (%p3524_p12), %s1773_s29, 128, %s1770_s10, %s1654_s19  }
 0x40c   : > { %s3525_s12 = sshll.u32 %s3520_s22, 7  ;;  %s3526_s9 = sld [smem:[#allocation31_spill]] }
 0x40d   : > { %s1785_s15 = sshll.u32 %s3086_s20, 4  ;;  %s2821_s14 = smov [#allocation13]   ;;  %s1786_s15 = int_to_ptr.vmem [resolvable:$true] %s1785_s15 }
 0x40e   : > { %s2672_s23 = scalar_lea.vmem %s1786_s15, 128  ;;  %s2676_s16 = sshll.u32 %s2821_s14, 4  ;;  %s2677_s16 = int_to_ptr.vmem [resolvable:$false] %s2676_s16 }
 0x40f   : > { %p2673_p5 = scmp.ne.s32.totalorder %s1786_s15, %s2672_s23  ;;  %s2678_s17 = scalar_lea.vmem %s2677_s16, 256 }
 0x410   : > { %p2679_p3 = scmp.lt.s32.totalorder %s1786_s15, %s2677_s16  ;;  %p2680_p7 = scmp.lt.s32.totalorder %s2678_s17, %s2672_s23 }
 0x411   : > { %p2674_p9 = pnand %p2673_p5, %p3524_p12 }
 0x412   : > { %s3402_s27 = scalar_lea.hbm %s3526_s9, %s3525_s12  ;;  %p2681_p8 = por %p2680_p7, %p2679_p3 }
 0x413   : > { %p2675_p11 = pneg %p2674_p9 }
 0x415   : > { %p2682_p13 = pnand %p2681_p8, %p2675_p11 }
 0x417   : > { %2685 = shalt.err (!%p2682_p13)
}
 0x418   : > { %s2686_s20 = scalar_lea.hbm %s3402_s27, 128  ;;  %s2690_s29 = scalar_lea.hbm %s3526_s9, 256 }
 0x419   : > { %p2687_p2 = scmp.ne.s32.totalorder %s3402_s27, %s2686_s20  ;;  %p2691_p10 = scmp.lt.u32.totalorder %s3402_s27, %s3526_s9 }
 0x41a   : > { %p2692_p0 = scmp.lt.u32.totalorder %s2690_s29, %s2686_s20  ;;  %p2694_p5 = scmp.lt.u32.totalorder %s2686_s20, %s3402_s27 }
 0x41b   : > { %p2688_p4 = pnand %p2687_p2, %p3524_p12 }
 0x41c   : > { %p2693_p1 = por %p2692_p0, %p2691_p10 }
 0x41d   : > { %p2689_p6 = pneg %p2688_p4 }
 0x41e   : > { %p2695_p9 = por %p2694_p5, %p2693_p1 }
 0x420   : > { %p2696_p11 = pnand %p2695_p9, %p2689_p6 }
 0x422   : > { %2699 = shalt.err (!%p2696_p11)
}
 0x423   : > { %s3527_s11 = scalar_lea.sflag [#allocation14], %s3079_s28 }
 0x424   : > { %2475 = dma.vmem_to_hbm [thread:$0]  (%p3524_p12), %s1786_s15, 128, %s3402_s27, %s3527_s11  }
 0x425 PF: > { %s3528_s30 = sld [smem:[#allocation18_spill]]  ;;  %s3529_s23 = sld [smem:[#allocation27_spill]] }
 0x426   : > { %p2491_p3 = scmp.ge.s32.totalorder %s2802_s26, 2 }
 0x42b   : > { %s1804_s14 = sand.u32 1, %s3528_s30   ;;  %p3530_p7 = scmp.ne.s32.totalorder %s3529_s23, 0 }
 0x42c   : > { %s1805_s16 = scalar_lea.sflag [#allocation10], %s1804_s14 }
 0x42d   : > { %p2483_p8 = pnand %p2491_p3, %p3530_p7 }
 0x42f   : > { %2757 = dma.done.wait (!%p2483_p8), %s1805_s16, 128  }
 0x430   : > { %2759 = vsyncadd (!%p2483_p8), %s1805_s16, 4294967168  ;;  %s1814_s17 = scalar_lea.sflag [#allocation14], %s1804_s14 }
 0x431   : > { %2761 = dma.done.wait (!%p2483_p8), %s1814_s17, 128  }
 0x432   : > { %2763 = vsyncadd (!%p2483_p8), %s1814_s17, 4294967168  ;;  %s29_s26 = sadd.s32 1, %s2802_s26   ;;  %s3531_s28 = sld [smem:[#allocation19_spill]] }
 0x433   : > { %p26_p13 = scmp.ge.s32.totalorder %s29_s26, 6   ;;  %s3532_s19 = sld [smem:[#allocation25_spill]] }
 0x434   : > { %s3533_s13 = sld [smem:[#allocation26_spill]]  ;;  %s3534_s27 = sld [smem:[#allocation21_spill]] }
 0x435   : > { %s3535_s15 = sld [smem:[#allocation22_spill]]  ;;  %s3536_s17 = smov %s2770_s18 }
 0x436   : > { %s3538_s20 = smov %s2782_s21  ;;  %s3540_s22 = smov %s2794_s24 }
 0x437   : > { %s3541_s23 = smov %s2798_s25  ;;  %28 = sbr.rel (!%p26_p13) target bundleno = 14 (0xe), region = 275 }
 0x438   : > { %s3537_s18 = smov %s3531_s28 }
 0x43a   : > { %s3539_s21 = smov %s3533_s13  ;;  %s3542_s24 = smov %s3534_s27 }
 0x43b   : > { %s3543_s25 = smov %s3535_s15 }
 0x43e   :  { %1819 = vsyncpa [#allocation9], 1 }
 0x43f   :  { %1821 = vsyncpa [#allocation9 + $0x1], 1 }
 0x440   :  { %1822 = vsyncpa [#allocation10], 1 }
 0x441   :  { %1824 = vsyncpa [#allocation10 + $0x1], 1 }
 0x442   :  { %1825 = vsyncpa [#allocation14], 1 }
 0x443   :  { %1827 = vsyncpa [#allocation14 + $0x1], 1 }

</bundles_post_ra>
